<compile_context>
chip_gen: v7x
topology: tpu7x:2x2x1
jax: 0.10.0
libtpu: 0.0.40
codegen_flags: <defaults>
</compile_context>

<pallas_src>
import jax
import jax.numpy as jnp
from jax.experimental import pallas as pl
from jax.experimental.pallas import tpu as pltpu

# ---- small, module-consistent sizes -----------------------------------------
B = 2              # batch
N_NO = 4           # num_no_texts
L = 8              # context_length (pad 77 -> multiple of 8 at real sizes)
D = 128            # embedding_dim / transformer width (lane-dense)
H = 4              # attention heads
HD = D // H        # head dim
MLP = 4 * D        # MLP hidden
N_LAYERS = 2       # fused resblock stack depth
EPS = 1e-5
SCALE = 1.0 / (HD ** 0.5)
NEG_INF = -1e30


def _ln(x, w, b):
    mu = jnp.mean(x, axis=-1, keepdims=True)
    var = jnp.mean((x - mu) ** 2, axis=-1, keepdims=True)
    return (x - mu) * jax.lax.rsqrt(var + EPS) * w + b


def _quick_gelu(x):
    # CLIP's QuickGELU: x * sigmoid(1.702 x)
    return x / (1.0 + jnp.exp(-1.702 * x)) * 1.0 if False else x * (1.0 / (1.0 + jnp.exp(-1.702 * x)))


# ---------------- single fused kernel (all layers, one launch) -----------------
def clipn_stack_kernel(prompt_ref, x_ref,
                       ln1w_ref, ln1b_ref,
                       wqkv_ref, bqkv_ref, wo_ref, bo_ref,
                       ln2w_ref, ln2b_ref,
                       w1_ref, b1_ref, w2_ref, b2_ref,
                       o_ref, xs_ref):
    layer = pl.program_id(0)

    # --- CLIPN "no"-prompt mean + broadcast add (once, at layer 0) ---
    @pl.when(layer == 0)
    def _():
        pmean = jnp.mean(prompt_ref[...], axis=0)                    # (L, D)
        xs_ref[...] = (x_ref[...] + pmean[None]).reshape(B * L, D)   # carry in VMEM

    xf = xs_ref[...]                                                 # (B*L, D) f32

    # --- pre-LN causal multi-head self-attention ---
    h1 = _ln(xf, ln1w_ref[0], ln1b_ref[0])
    # ONE fused lane-dense QKV projection: (B*L, D) @ (D, 3D)
    qkv = jnp.dot(h1, wqkv_ref[0], preferred_element_type=jnp.float32) + bqkv_ref[0]

    def split_heads(t2d):
        # (B*L, H*HD) -> (H*B, L, HD): 32-lane head slices stacked on the batch dim.
        cols = [t2d[:, h * HD:(h + 1) * HD].reshape(B, L, HD) for h in range(H)]
        return jnp.concatenate(cols, axis=0)

    def merge_heads(t3d):
        # (H*B, L, HD) -> (B*L, H*HD): lane-concat of ctx heads (review item 2).
        cols = [t3d[h * B:(h + 1) * B].reshape(B * L, HD) for h in range(H)]
        return jnp.concatenate(cols, axis=1)

    q = split_heads(qkv[:, 0 * D:1 * D])                             # (B*H, L, HD)
    k = split_heads(qkv[:, 1 * D:2 * D])
    v = split_heads(qkv[:, 2 * D:3 * D])

    # attention core batched over B*H in one shot
    s = jnp.einsum('xld,xmd->xlm', q, k,
                   preferred_element_type=jnp.float32) * SCALE       # (B*H, L, L)
    row = jax.lax.broadcasted_iota(jnp.int32, (L, L), 0)
    col = jax.lax.broadcasted_iota(jnp.int32, (L, L), 1)
    s = jnp.where((col <= row)[None], s, NEG_INF)                    # causal mask
    s = s - jnp.max(s, axis=-1, keepdims=True)
    p = jnp.exp(s)
    p = p * pl.reciprocal(jnp.sum(p, axis=-1, keepdims=True), approx=True)
    ctx = jnp.einsum('xlm,xmd->xld', p, v,
                     preferred_element_type=jnp.float32)             # (B*H, L, HD)

    # ONE full-depth output projection against the original wo
    ctx_f = merge_heads(ctx)                                         # (B*L, D)
    attn = jnp.dot(ctx_f, wo_ref[0], preferred_element_type=jnp.float32) + bo_ref[0]
    x1 = xf + attn

    # --- pre-LN MLP (QuickGELU) ---
    h2 = _ln(x1, ln2w_ref[0], ln2b_ref[0])
    m = jnp.dot(h2, w1_ref[0], preferred_element_type=jnp.float32) + b1_ref[0]
    m = _quick_gelu(m)
    m = jnp.dot(m, w2_ref[0], preferred_element_type=jnp.float32) + b2_ref[0]
    x2 = x1 + m

    xs_ref[...] = x2                                                 # carry to next layer

    @pl.when(layer == pl.num_programs(0) - 1)
    def _():
        o_ref[...] = x2.reshape(B, L, D).astype(o_ref.dtype)


# ---------------- wrapper -------------------------------------------------------
def clipn_adapter_forward(x, prompt_no, params):
    """CLIPN text-'no' adapter forward (eval): prompt-add + N_LAYERS transformer blocks."""
    assert x.shape == (B, L, D) and prompt_no.shape == (N_NO, L, D)
    assert D % 128 == 0 and L % 8 == 0 and D % H == 0   # lane-dense / tile-aligned

    def full(shape):          # whole-array block, resident across the layer grid
        return pl.BlockSpec(shape, lambda l, _n=len(shape): (0,) * _n)

    def per_layer(r, c):      # stream one layer's slab per grid step
        return pl.BlockSpec((1, r, c), lambda l: (l, 0, 0))

    in_specs = [
        full((N_NO, L, D)),          # prompt_no
        full((B, L, D)),             # x (token embeddings)
        per_layer(1, D),             # ln1w
        per_layer(1, D),             # ln1b
        per_layer(D, 3 * D),         # wqkv
        per_layer(1, 3 * D),         # bqkv
        per_layer(D, D),             # wo
        per_layer(1, D),             # bo
        per_layer(1, D),             # ln2w
        per_layer(1, D),             # ln2b
        per_layer(D, MLP),           # w1
        per_layer(1, MLP),           # b1
        per_layer(MLP, D),           # w2
        per_layer(1, D),             # b2
    ]
    args = (prompt_no, x,
            params['ln1w'], params['ln1b'],
            params['wqkv'], params['bqkv'], params['wo'], params['bo'],
            params['ln2w'], params['ln2b'],
            params['w1'], params['b1'], params['w2'], params['b2'])

    return pl.pallas_call(
        clipn_stack_kernel,
        out_shape=jax.ShapeDtypeStruct((B, L, D), x.dtype),
        grid_spec=pltpu.PrefetchScalarGridSpec(
            num_scalar_prefetch=0,
            grid=(N_LAYERS,),
            in_specs=in_specs,
            out_specs=pl.BlockSpec((B, L, D), lambda l: (0, 0, 0)),
            scratch_shapes=[pltpu.VMEM((B * L, D), jnp.float32)],
        ),
        compiler_params=pltpu.CompilerParams(
            dimension_semantics=("arbitrary",)),   # layer axis is sequential
    )(*args)


# ---------------- pure-JAX reference ------------------------------------------
def ref_forward(x, prompt_no, p):
    hi = jax.lax.Precision.HIGHEST
    x = x + jnp.mean(prompt_no, axis=0, keepdims=True)
    causal = jnp.tril(jnp.ones((L, L), dtype=bool))
    for ly in range(N_LAYERS):
        h = _ln(x, p['ln1w'][ly], p['ln1b'][ly])
        qkv = jnp.einsum('bld,de->ble', h, p['wqkv'][ly], precision=hi) + p['bqkv'][ly]
        q, k, v = jnp.split(qkv, 3, axis=-1)
        q = q.reshape(B, L, H, HD).transpose(0, 2, 1, 3)
        k = k.reshape(B, L, H, HD).transpose(0, 2, 1, 3)
        v = v.reshape(B, L, H, HD).transpose(0, 2, 1, 3)
        s = jnp.einsum('bhld,bhmd->bhlm', q, k, precision=hi) * SCALE
        s = jnp.where(causal[None, None], s, NEG_INF)
        pr = jax.nn.softmax(s, axis=-1)
        ctx = jnp.einsum('bhlm,bhmd->bhld', pr, v, precision=hi)
        ctx = ctx.transpose(0, 2, 1, 3).reshape(B, L, D)
        x = x + jnp.einsum('bld,de->ble', ctx, p['wo'][ly], precision=hi) + p['bo'][ly]

        h2 = _ln(x, p['ln2w'][ly], p['ln2b'][ly])
        m = jnp.einsum('bld,de->ble', h2, p['w1'][ly], precision=hi) + p['b1'][ly]
        m = m * jax.nn.sigmoid(1.702 * m)          # QuickGELU
        m = jnp.einsum('ble,ed->bld', m, p['w2'][ly], precision=hi) + p['b2'][ly]
        x = x + m
    return x


# ---------------- deterministic parameter init (stacked per-layer) --------------
def init_params(key):
    ks = jax.random.split(key, 12)
    f32 = jnp.float32
    NL = N_LAYERS
    return {
        'ln1w': 1.0 + 0.1 * jax.random.normal(ks[0], (NL, 1, D), f32),
        'ln1b': 0.1 * jax.random.normal(ks[1], (NL, 1, D), f32),
        'wqkv': 0.02 * jax.random.normal(ks[2], (NL, D, 3 * D), f32),
        'bqkv': 0.02 * jax.random.normal(ks[3], (NL, 1, 3 * D), f32),
        'wo':   0.02 * jax.random.normal(ks[4], (NL, D, D), f32),
        'bo':   0.02 * jax.random.normal(ks[5], (NL, 1, D), f32),
        'ln2w': 1.0 + 0.1 * jax.random.normal(ks[6], (NL, 1, D), f32),
        'ln2b': 0.1 * jax.random.normal(ks[7], (NL, 1, D), f32),
        'w1':   0.02 * jax.random.normal(ks[8], (NL, D, MLP), f32),
        'b1':   0.02 * jax.random.normal(ks[9], (NL, 1, MLP), f32),
        'w2':   0.02 * jax.random.normal(ks[10], (NL, MLP, D), f32),
        'b2':   0.02 * jax.random.normal(ks[11], (NL, 1, D), f32),
    }


if __name__ == "__main__":
    key = jax.random.PRNGKey(0)
    k_x, k_p, k_w = jax.random.split(key, 3)

    x = jax.random.normal(k_x, (B, L, D), jnp.float32)
    # nn.init.normal_(self.prompt_no, std=0.01)
    prompt_no = 0.01 * jax.random.normal(k_p, (N_NO, L, D), jnp.float32)
    params = init_params(k_w)

    out = jax.jit(clipn_adapter_forward)(x, prompt_no, params)
    out = jax.block_until_ready(out)

    ref = ref_forward(x, prompt_no, params)
    assert out.shape == (B, L, D)
    max_diff = jnp.max(jnp.abs(out - ref))
    assert jnp.allclose(out, ref, atol=1e-2, rtol=1e-2), f"max abs diff {max_diff}"

    print("KERNEL_OK")
</pallas_src>

<mosaic_0001>
module attributes {stable_mosaic.version = 11 : i64} {
  func.func @clipn_stack_kernel(%arg0: i32, %arg1: memref<4x8x128xf32, #tpu.memory_space<vmem>>, %arg2: memref<2x8x128xf32, #tpu.memory_space<vmem>>, %arg3: memref<1x1x128xf32, #tpu.memory_space<vmem>>, %arg4: memref<1x1x128xf32, #tpu.memory_space<vmem>>, %arg5: memref<1x128x384xf32, #tpu.memory_space<vmem>>, %arg6: memref<1x1x384xf32, #tpu.memory_space<vmem>>, %arg7: memref<1x128x128xf32, #tpu.memory_space<vmem>>, %arg8: memref<1x1x128xf32, #tpu.memory_space<vmem>>, %arg9: memref<1x1x128xf32, #tpu.memory_space<vmem>>, %arg10: memref<1x1x128xf32, #tpu.memory_space<vmem>>, %arg11: memref<1x128x512xf32, #tpu.memory_space<vmem>>, %arg12: memref<1x1x512xf32, #tpu.memory_space<vmem>>, %arg13: memref<1x512x128xf32, #tpu.memory_space<vmem>>, %arg14: memref<1x1x128xf32, #tpu.memory_space<vmem>>, %arg15: memref<2x8x128xf32, #tpu.memory_space<vmem>>, %arg16: memref<16x128xf32, #tpu.memory_space<vmem>>) attributes {dimension_semantics = [#tpu.dimension_semantics<arbitrary>], iteration_bounds = array<i64: 2>, scalar_prefetch = 0 : i64, scratch_operands = 1 : i64, tpu.core_type = #tpu.core_type<tc>, window_params = [{pipeline_mode = #tpu.pipeline_mode<synchronous>, transform_indices = @transform_0, window_bounds = array<i64: 4, 8, 128>}, {pipeline_mode = #tpu.pipeline_mode<synchronous>, transform_indices = @transform_1, window_bounds = array<i64: 2, 8, 128>}, {transform_indices = @transform_2, window_bounds = array<i64: 1, 1, 128>}, {transform_indices = @transform_3, window_bounds = array<i64: 1, 1, 128>}, {transform_indices = @transform_4, window_bounds = array<i64: 1, 128, 384>}, {transform_indices = @transform_5, window_bounds = array<i64: 1, 1, 384>}, {transform_indices = @transform_6, window_bounds = array<i64: 1, 128, 128>}, {transform_indices = @transform_7, window_bounds = array<i64: 1, 1, 128>}, {transform_indices = @transform_8, window_bounds = array<i64: 1, 1, 128>}, {transform_indices = @transform_9, window_bounds = array<i64: 1, 1, 128>}, {transform_indices = @transform_10, window_bounds = array<i64: 1, 128, 512>}, {transform_indices = @transform_11, window_bounds = array<i64: 1, 1, 512>}, {transform_indices = @transform_12, window_bounds = array<i64: 1, 512, 128>}, {transform_indices = @transform_13, window_bounds = array<i64: 1, 1, 128>}, {pipeline_mode = #tpu.pipeline_mode<synchronous>, transform_indices = @transform_14, window_bounds = array<i64: 2, 8, 128>}]} {
    %c0_i32 = arith.constant 0 : i32
    %0 = arith.cmpi eq, %arg0, %c0_i32 : i32
    %1 = arith.extui %0 : i1 to i32
    %c0_i32_0 = arith.constant 0 : i32
    %2 = arith.cmpi ne, %1, %c0_i32_0 : i32
    scf.if %2 {
      %c0_63 = arith.constant 0 : index
      %c0_64 = arith.constant 0 : index
      %c0_65 = arith.constant 0 : index
      %159 = vector.load %arg1[%c0_63, %c0_64, %c0_65] : memref<4x8x128xf32, #tpu.memory_space<vmem>>, vector<4x8x128xf32>
      %cst_66 = arith.constant dense<0.000000e+00> : vector<8x128xf32>
      %160 = vector.multi_reduction <add>, %159, %cst_66 [0] : vector<4x8x128xf32> to vector<8x128xf32>
      %cst_67 = arith.constant 4.000000e+00 : f32
      %161 = vector.broadcast %cst_67 : f32 to vector<8x128xf32>
      %162 = arith.divf %160, %161 : vector<8x128xf32>
      %c0_68 = arith.constant 0 : index
      %c0_69 = arith.constant 0 : index
      %c0_70 = arith.constant 0 : index
      %163 = vector.load %arg2[%c0_68, %c0_69, %c0_70] : memref<2x8x128xf32, #tpu.memory_space<vmem>>, vector<2x8x128xf32>
      %164 = vector.shape_cast %162 : vector<8x128xf32> to vector<1x8x128xf32>
      %165 = vector.broadcast %164 : vector<1x8x128xf32> to vector<2x8x128xf32>
      %166 = arith.addf %163, %165 : vector<2x8x128xf32>
      %167 = vector.shape_cast %166 : vector<2x8x128xf32> to vector<16x128xf32>
      %c0_71 = arith.constant 0 : index
      %c0_72 = arith.constant 0 : index
      %168 = vector.load %arg16[%c0_71, %c0_72] : memref<16x128xf32, #tpu.memory_space<vmem>>, vector<16x128xf32>
      tpu.vector_store %arg16[%c0_71, %c0_72], %167 {strides = array<i32>} : memref<16x128xf32, #tpu.memory_space<vmem>>, vector<16x128xf32>,
    } else {
    }
    %c0 = arith.constant 0 : index
    %c0_1 = arith.constant 0 : index
    %3 = vector.load %arg16[%c0, %c0_1] : memref<16x128xf32, #tpu.memory_space<vmem>>, vector<16x128xf32>
    %c0_2 = arith.constant 0 : index
    %c0_3 = arith.constant 0 : index
    %c0_4 = arith.constant 0 : index
    %4 = vector.load %arg3[%c0_2, %c0_3, %c0_4] : memref<1x1x128xf32, #tpu.memory_space<vmem>>, vector<1x1x128xf32>
    %5 = vector.shape_cast %4 : vector<1x1x128xf32> to vector<1x128xf32>
    %c0_5 = arith.constant 0 : index
    %c0_6 = arith.constant 0 : index
    %c0_7 = arith.constant 0 : index
    %6 = vector.load %arg4[%c0_5, %c0_6, %c0_7] : memref<1x1x128xf32, #tpu.memory_space<vmem>>, vector<1x1x128xf32>
    %7 = vector.shape_cast %6 : vector<1x1x128xf32> to vector<1x128xf32>
    %cst = arith.constant dense<0.000000e+00> : vector<16xf32>
    %8 = vector.multi_reduction <add>, %3, %cst [1] : vector<16x128xf32> to vector<16xf32>
    %9 = vector.shape_cast %8 : vector<16xf32> to vector<16x1xf32>
    %cst_8 = arith.constant 1.280000e+02 : f32
    %10 = vector.broadcast %cst_8 : f32 to vector<16x1xf32>
    %11 = arith.divf %9, %10 : vector<16x1xf32>
    %12 = vector.broadcast %11 : vector<16x1xf32> to vector<16x128xf32>
    %13 = arith.subf %3, %12 : vector<16x128xf32>
    %14 = arith.mulf %13, %13 : vector<16x128xf32>
    %cst_9 = arith.constant dense<0.000000e+00> : vector<16xf32>
    %15 = vector.multi_reduction <add>, %14, %cst_9 [1] : vector<16x128xf32> to vector<16xf32>
    %16 = vector.shape_cast %15 : vector<16xf32> to vector<16x1xf32>
    %cst_10 = arith.constant 1.280000e+02 : f32
    %17 = vector.broadcast %cst_10 : f32 to vector<16x1xf32>
    %18 = arith.divf %16, %17 : vector<16x1xf32>
    %19 = vector.broadcast %11 : vector<16x1xf32> to vector<16x128xf32>
    %20 = arith.subf %3, %19 : vector<16x128xf32>
    %cst_11 = arith.constant 9.99999974E-6 : f32
    %21 = vector.broadcast %cst_11 : f32 to vector<16x1xf32>
    %22 = arith.addf %18, %21 : vector<16x1xf32>
    %23 = math.rsqrt %22 : vector<16x1xf32>
    %24 = vector.broadcast %23 : vector<16x1xf32> to vector<16x128xf32>
    %25 = arith.mulf %20, %24 : vector<16x128xf32>
    %26 = vector.broadcast %5 : vector<1x128xf32> to vector<16x128xf32>
    %27 = arith.mulf %25, %26 : vector<16x128xf32>
    %28 = vector.broadcast %7 : vector<1x128xf32> to vector<16x128xf32>
    %29 = arith.addf %27, %28 : vector<16x128xf32>
    %c0_12 = arith.constant 0 : index
    %c0_13 = arith.constant 0 : index
    %c0_14 = arith.constant 0 : index
    %30 = vector.load %arg5[%c0_12, %c0_13, %c0_14] : memref<1x128x384xf32, #tpu.memory_space<vmem>>, vector<1x128x384xf32>
    %31 = vector.shape_cast %30 : vector<1x128x384xf32> to vector<128x384xf32>
    %cst_15 = arith.constant dense<0.000000e+00> : vector<16x384xf32>
    %32 = tpu.matmul %29, %31, %cst_15 {dimension_numbers = #tpu.dot_dimension_numbers<[1], [0], [0], [1], [0, 0, 1, 1], [], []>} : vector<16x128xf32>, vector<128x384xf32>, vector<16x384xf32> -> vector<16x384xf32>
    %c0_16 = arith.constant 0 : index
    %c0_17 = arith.constant 0 : index
    %c0_18 = arith.constant 0 : index
    %33 = vector.load %arg6[%c0_16, %c0_17, %c0_18] : memref<1x1x384xf32, #tpu.memory_space<vmem>>, vector<1x1x384xf32>
    %34 = vector.shape_cast %33 : vector<1x1x384xf32> to vector<1x384xf32>
    %35 = vector.broadcast %34 : vector<1x384xf32> to vector<16x384xf32>
    %36 = arith.addf %32, %35 : vector<16x384xf32>
    %37 = vector.extract_strided_slice %36 {offsets = [0, 0], sizes = [16, 128], strides = [1, 1]} : vector<16x384xf32> to vector<16x128xf32>
    %38 = vector.extract_strided_slice %37 {offsets = [0, 0], sizes = [16, 32], strides = [1, 1]} : vector<16x128xf32> to vector<16x32xf32>
    %39 = vector.shape_cast %38 : vector<16x32xf32> to vector<2x8x32xf32>
    %40 = vector.extract_strided_slice %37 {offsets = [0, 32], sizes = [16, 32], strides = [1, 1]} : vector<16x128xf32> to vector<16x32xf32>
    %41 = vector.shape_cast %40 : vector<16x32xf32> to vector<2x8x32xf32>
    %42 = vector.extract_strided_slice %37 {offsets = [0, 64], sizes = [16, 32], strides = [1, 1]} : vector<16x128xf32> to vector<16x32xf32>
    %43 = vector.shape_cast %42 : vector<16x32xf32> to vector<2x8x32xf32>
    %44 = vector.extract_strided_slice %37 {offsets = [0, 96], sizes = [16, 32], strides = [1, 1]} : vector<16x128xf32> to vector<16x32xf32>
    %45 = vector.shape_cast %44 : vector<16x32xf32> to vector<2x8x32xf32>
    %46 = tpu.concatenate %39, %41, %43, %45 in 0 : vector<2x8x32xf32>, vector<2x8x32xf32>, vector<2x8x32xf32>, vector<2x8x32xf32> -> vector<8x8x32xf32>
    %47 = vector.extract_strided_slice %36 {offsets = [0, 128], sizes = [16, 128], strides = [1, 1]} : vector<16x384xf32> to vector<16x128xf32>
    %48 = vector.extract_strided_slice %47 {offsets = [0, 0], sizes = [16, 32], strides = [1, 1]} : vector<16x128xf32> to vector<16x32xf32>
    %49 = vector.shape_cast %48 : vector<16x32xf32> to vector<2x8x32xf32>
    %50 = vector.extract_strided_slice %47 {offsets = [0, 32], sizes = [16, 32], strides = [1, 1]} : vector<16x128xf32> to vector<16x32xf32>
    %51 = vector.shape_cast %50 : vector<16x32xf32> to vector<2x8x32xf32>
    %52 = vector.extract_strided_slice %47 {offsets = [0, 64], sizes = [16, 32], strides = [1, 1]} : vector<16x128xf32> to vector<16x32xf32>
    %53 = vector.shape_cast %52 : vector<16x32xf32> to vector<2x8x32xf32>
    %54 = vector.extract_strided_slice %47 {offsets = [0, 96], sizes = [16, 32], strides = [1, 1]} : vector<16x128xf32> to vector<16x32xf32>
    %55 = vector.shape_cast %54 : vector<16x32xf32> to vector<2x8x32xf32>
    %56 = tpu.concatenate %49, %51, %53, %55 in 0 : vector<2x8x32xf32>, vector<2x8x32xf32>, vector<2x8x32xf32>, vector<2x8x32xf32> -> vector<8x8x32xf32>
    %57 = vector.extract_strided_slice %36 {offsets = [0, 256], sizes = [16, 128], strides = [1, 1]} : vector<16x384xf32> to vector<16x128xf32>
    %58 = vector.extract_strided_slice %57 {offsets = [0, 0], sizes = [16, 32], strides = [1, 1]} : vector<16x128xf32> to vector<16x32xf32>
    %59 = vector.shape_cast %58 : vector<16x32xf32> to vector<2x8x32xf32>
    %60 = vector.extract_strided_slice %57 {offsets = [0, 32], sizes = [16, 32], strides = [1, 1]} : vector<16x128xf32> to vector<16x32xf32>
    %61 = vector.shape_cast %60 : vector<16x32xf32> to vector<2x8x32xf32>
    %62 = vector.extract_strided_slice %57 {offsets = [0, 64], sizes = [16, 32], strides = [1, 1]} : vector<16x128xf32> to vector<16x32xf32>
    %63 = vector.shape_cast %62 : vector<16x32xf32> to vector<2x8x32xf32>
    %64 = vector.extract_strided_slice %57 {offsets = [0, 96], sizes = [16, 32], strides = [1, 1]} : vector<16x128xf32> to vector<16x32xf32>
    %65 = vector.shape_cast %64 : vector<16x32xf32> to vector<2x8x32xf32>
    %66 = tpu.concatenate %59, %61, %63, %65 in 0 : vector<2x8x32xf32>, vector<2x8x32xf32>, vector<2x8x32xf32>, vector<2x8x32xf32> -> vector<8x8x32xf32>
    "tpu.trace_start"() <{level = 10 : i32, message = "xld,xmd->xlm"}> : () -> ()
    %cst_19 = arith.constant dense<0.000000e+00> : vector<8x8x8xf32>
    %67 = tpu.matmul %46, %56, %cst_19 {dimension_numbers = #tpu.dot_dimension_numbers<[2], [2], [1], [1], [0, 0, 0, 1, 1, 1], [0], [0]>} : vector<8x8x32xf32>, vector<8x8x32xf32>, vector<8x8x8xf32> -> vector<8x8x8xf32>
    "tpu.trace_stop"() : () -> ()
    %cst_20 = arith.constant 0.176776692 : f32
    %68 = vector.broadcast %cst_20 : f32 to vector<8x8x8xf32>
    %69 = arith.mulf %67, %68 : vector<8x8x8xf32>
    %70 = tpu.iota {dimensions = array<i32: 0>} : vector<8x8xi32>
    %71 = tpu.iota {dimensions = array<i32: 1>} : vector<8x8xi32>
    %72 = arith.cmpi sle, %71, %70 : vector<8x8xi32>
    %73 = vector.shape_cast %72 : vector<8x8xi1> to vector<1x8x8xi1>
    %cst_21 = arith.constant -1.000000e+30 : f32
    %74 = vector.shape_cast %73 : vector<1x8x8xi1> to vector<1x8x8xi1>
    %75 = vector.broadcast %74 : vector<1x8x8xi1> to vector<8x8x8xi1>
    %76 = vector.broadcast %cst_21 : f32 to vector<8x8x8xf32>
    %77 = arith.select %75, %69, %76 : vector<8x8x8xi1>, vector<8x8x8xf32>
    %cst_22 = arith.constant dense<0xFF800000> : vector<8x8xf32>
    %78 = vector.multi_reduction <maximumf>, %77, %cst_22 [2] : vector<8x8x8xf32> to vector<8x8xf32>
    %79 = vector.shape_cast %78 : vector<8x8xf32> to vector<8x8x1xf32>
    %80 = vector.broadcast %79 : vector<8x8x1xf32> to vector<8x8x8xf32>
    %81 = arith.subf %77, %80 : vector<8x8x8xf32>
    %82 = math.exp %81 : vector<8x8x8xf32>
    %cst_23 = arith.constant dense<0.000000e+00> : vector<8x8xf32>
    %83 = vector.multi_reduction <add>, %82, %cst_23 [2] : vector<8x8x8xf32> to vector<8x8xf32>
    %84 = vector.shape_cast %83 : vector<8x8xf32> to vector<8x8x1xf32>
    %85 = tpu.reciprocal %84 {approx = true} : vector<8x8x1xf32> -> vector<8x8x1xf32>
    %86 = vector.broadcast %85 : vector<8x8x1xf32> to vector<8x8x8xf32>
    %87 = arith.mulf %82, %86 : vector<8x8x8xf32>
    "tpu.trace_start"() <{level = 10 : i32, message = "xlm,xmd->xld"}> : () -> ()
    %cst_24 = arith.constant dense<0.000000e+00> : vector<8x8x32xf32>
    %88 = tpu.matmul %87, %66, %cst_24 {dimension_numbers = #tpu.dot_dimension_numbers<[2], [1], [1], [2], [0, 0, 0, 1, 1, 2], [0], [0]>} : vector<8x8x8xf32>, vector<8x8x32xf32>, vector<8x8x32xf32> -> vector<8x8x32xf32>
    "tpu.trace_stop"() : () -> ()
    %89 = vector.extract_strided_slice %88 {offsets = [0, 0, 0], sizes = [2, 8, 32], strides = [1, 1, 1]} : vector<8x8x32xf32> to vector<2x8x32xf32>
    %90 = vector.shape_cast %89 : vector<2x8x32xf32> to vector<16x32xf32>
    %91 = vector.extract_strided_slice %88 {offsets = [2, 0, 0], sizes = [2, 8, 32], strides = [1, 1, 1]} : vector<8x8x32xf32> to vector<2x8x32xf32>
    %92 = vector.shape_cast %91 : vector<2x8x32xf32> to vector<16x32xf32>
    %93 = vector.extract_strided_slice %88 {offsets = [4, 0, 0], sizes = [2, 8, 32], strides = [1, 1, 1]} : vector<8x8x32xf32> to vector<2x8x32xf32>
    %94 = vector.shape_cast %93 : vector<2x8x32xf32> to vector<16x32xf32>
    %95 = vector.extract_strided_slice %88 {offsets = [6, 0, 0], sizes = [2, 8, 32], strides = [1, 1, 1]} : vector<8x8x32xf32> to vector<2x8x32xf32>
    %96 = vector.shape_cast %95 : vector<2x8x32xf32> to vector<16x32xf32>
    %97 = tpu.concatenate %90, %92, %94, %96 in 1 : vector<16x32xf32>, vector<16x32xf32>, vector<16x32xf32>, vector<16x32xf32> -> vector<16x128xf32>
    %c0_25 = arith.constant 0 : index
    %c0_26 = arith.constant 0 : index
    %c0_27 = arith.constant 0 : index
    %98 = vector.load %arg7[%c0_25, %c0_26, %c0_27] : memref<1x128x128xf32, #tpu.memory_space<vmem>>, vector<1x128x128xf32>
    %99 = vector.shape_cast %98 : vector<1x128x128xf32> to vector<128x128xf32>
    %cst_28 = arith.constant dense<0.000000e+00> : vector<16x128xf32>
    %100 = tpu.matmul %97, %99, %cst_28 {dimension_numbers = #tpu.dot_dimension_numbers<[1], [0], [0], [1], [0, 0, 1, 1], [], []>} : vector<16x128xf32>, vector<128x128xf32>, vector<16x128xf32> -> vector<16x128xf32>
    %c0_29 = arith.constant 0 : index
    %c0_30 = arith.constant 0 : index
    %c0_31 = arith.constant 0 : index
    %101 = vector.load %arg8[%c0_29, %c0_30, %c0_31] : memref<1x1x128xf32, #tpu.memory_space<vmem>>, vector<1x1x128xf32>
    %102 = vector.shape_cast %101 : vector<1x1x128xf32> to vector<1x128xf32>
    %103 = vector.broadcast %102 : vector<1x128xf32> to vector<16x128xf32>
    %104 = arith.addf %100, %103 : vector<16x128xf32>
    %105 = arith.addf %3, %104 : vector<16x128xf32>
    %c0_32 = arith.constant 0 : index
    %c0_33 = arith.constant 0 : index
    %c0_34 = arith.constant 0 : index
    %106 = vector.load %arg9[%c0_32, %c0_33, %c0_34] : memref<1x1x128xf32, #tpu.memory_space<vmem>>, vector<1x1x128xf32>
    %107 = vector.shape_cast %106 : vector<1x1x128xf32> to vector<1x128xf32>
    %c0_35 = arith.constant 0 : index
    %c0_36 = arith.constant 0 : index
    %c0_37 = arith.constant 0 : index
    %108 = vector.load %arg10[%c0_35, %c0_36, %c0_37] : memref<1x1x128xf32, #tpu.memory_space<vmem>>, vector<1x1x128xf32>
    %109 = vector.shape_cast %108 : vector<1x1x128xf32> to vector<1x128xf32>
    %cst_38 = arith.constant dense<0.000000e+00> : vector<16xf32>
    %110 = vector.multi_reduction <add>, %105, %cst_38 [1] : vector<16x128xf32> to vector<16xf32>
    %111 = vector.shape_cast %110 : vector<16xf32> to vector<16x1xf32>
    %cst_39 = arith.constant 1.280000e+02 : f32
    %112 = vector.broadcast %cst_39 : f32 to vector<16x1xf32>
    %113 = arith.divf %111, %112 : vector<16x1xf32>
    %114 = vector.broadcast %113 : vector<16x1xf32> to vector<16x128xf32>
    %115 = arith.subf %105, %114 : vector<16x128xf32>
    %116 = arith.mulf %115, %115 : vector<16x128xf32>
    %cst_40 = arith.constant dense<0.000000e+00> : vector<16xf32>
    %117 = vector.multi_reduction <add>, %116, %cst_40 [1] : vector<16x128xf32> to vector<16xf32>
    %118 = vector.shape_cast %117 : vector<16xf32> to vector<16x1xf32>
    %cst_41 = arith.constant 1.280000e+02 : f32
    %119 = vector.broadcast %cst_41 : f32 to vector<16x1xf32>
    %120 = arith.divf %118, %119 : vector<16x1xf32>
    %121 = vector.broadcast %113 : vector<16x1xf32> to vector<16x128xf32>
    %122 = arith.subf %105, %121 : vector<16x128xf32>
    %cst_42 = arith.constant 9.99999974E-6 : f32
    %123 = vector.broadcast %cst_42 : f32 to vector<16x1xf32>
    %124 = arith.addf %120, %123 : vector<16x1xf32>
    %125 = math.rsqrt %124 : vector<16x1xf32>
    %126 = vector.broadcast %125 : vector<16x1xf32> to vector<16x128xf32>
    %127 = arith.mulf %122, %126 : vector<16x128xf32>
    %128 = vector.broadcast %107 : vector<1x128xf32> to vector<16x128xf32>
    %129 = arith.mulf %127, %128 : vector<16x128xf32>
    %130 = vector.broadcast %109 : vector<1x128xf32> to vector<16x128xf32>
    %131 = arith.addf %129, %130 : vector<16x128xf32>
    %c0_43 = arith.constant 0 : index
    %c0_44 = arith.constant 0 : index
    %c0_45 = arith.constant 0 : index
    %132 = vector.load %arg11[%c0_43, %c0_44, %c0_45] : memref<1x128x512xf32, #tpu.memory_space<vmem>>, vector<1x128x512xf32>
    %133 = vector.shape_cast %132 : vector<1x128x512xf32> to vector<128x512xf32>
    %cst_46 = arith.constant dense<0.000000e+00> : vector<16x512xf32>
    %134 = tpu.matmul %131, %133, %cst_46 {dimension_numbers = #tpu.dot_dimension_numbers<[1], [0], [0], [1], [0, 0, 1, 1], [], []>} : vector<16x128xf32>, vector<128x512xf32>, vector<16x512xf32> -> vector<16x512xf32>
    %c0_47 = arith.constant 0 : index
    %c0_48 = arith.constant 0 : index
    %c0_49 = arith.constant 0 : index
    %135 = vector.load %arg12[%c0_47, %c0_48, %c0_49] : memref<1x1x512xf32, #tpu.memory_space<vmem>>, vector<1x1x512xf32>
    %136 = vector.shape_cast %135 : vector<1x1x512xf32> to vector<1x512xf32>
    %137 = vector.broadcast %136 : vector<1x512xf32> to vector<16x512xf32>
    %138 = arith.addf %134, %137 : vector<16x512xf32>
    %cst_50 = arith.constant -1.702000e+00 : f32
    %139 = vector.broadcast %cst_50 : f32 to vector<16x512xf32>
    %140 = arith.mulf %139, %138 : vector<16x512xf32>
    %141 = math.exp %140 : vector<16x512xf32>
    %cst_51 = arith.constant 1.000000e+00 : f32
    %142 = vector.broadcast %cst_51 : f32 to vector<16x512xf32>
    %143 = arith.addf %142, %141 : vector<16x512xf32>
    %cst_52 = arith.constant 1.000000e+00 : f32
    %144 = vector.broadcast %cst_52 : f32 to vector<16x512xf32>
    %145 = arith.divf %144, %143 : vector<16x512xf32>
    %146 = arith.mulf %138, %145 : vector<16x512xf32>
    %c0_53 = arith.constant 0 : index
    %c0_54 = arith.constant 0 : index
    %c0_55 = arith.constant 0 : index
    %147 = vector.load %arg13[%c0_53, %c0_54, %c0_55] : memref<1x512x128xf32, #tpu.memory_space<vmem>>, vector<1x512x128xf32>
    %148 = vector.shape_cast %147 : vector<1x512x128xf32> to vector<512x128xf32>
    %cst_56 = arith.constant dense<0.000000e+00> : vector<16x128xf32>
    %149 = tpu.matmul %146, %148, %cst_56 {dimension_numbers = #tpu.dot_dimension_numbers<[1], [0], [0], [1], [0, 0, 1, 1], [], []>} : vector<16x512xf32>, vector<512x128xf32>, vector<16x128xf32> -> vector<16x128xf32>
    %c0_57 = arith.constant 0 : index
    %c0_58 = arith.constant 0 : index
    %c0_59 = arith.constant 0 : index
    %150 = vector.load %arg14[%c0_57, %c0_58, %c0_59] : memref<1x1x128xf32, #tpu.memory_space<vmem>>, vector<1x1x128xf32>
    %151 = vector.shape_cast %150 : vector<1x1x128xf32> to vector<1x128xf32>
    %152 = vector.broadcast %151 : vector<1x128xf32> to vector<16x128xf32>
    %153 = arith.addf %149, %152 : vector<16x128xf32>
    %154 = arith.addf %105, %153 : vector<16x128xf32>
    %c0_60 = arith.constant 0 : index
    %c0_61 = arith.constant 0 : index
    %155 = vector.load %arg16[%c0_60, %c0_61] : memref<16x128xf32, #tpu.memory_space<vmem>>, vector<16x128xf32>
    tpu.vector_store %arg16[%c0_60, %c0_61], %154 {strides = array<i32>} : memref<16x128xf32, #tpu.memory_space<vmem>>, vector<16x128xf32>,
    %c1_i32 = arith.constant 1 : i32
    %156 = arith.cmpi eq, %arg0, %c1_i32 : i32
    %157 = arith.extui %156 : i1 to i32
    %c0_i32_62 = arith.constant 0 : i32
    %158 = arith.cmpi ne, %157, %c0_i32_62 : i32
    scf.if %158 {
      %159 = vector.shape_cast %154 : vector<16x128xf32> to vector<2x8x128xf32>
      %c0_63 = arith.constant 0 : index
      %c0_64 = arith.constant 0 : index
      %c0_65 = arith.constant 0 : index
      %160 = vector.load %arg15[%c0_63, %c0_64, %c0_65] : memref<2x8x128xf32, #tpu.memory_space<vmem>>, vector<2x8x128xf32>
      tpu.vector_store %arg15[%c0_63, %c0_64, %c0_65], %159 {strides = array<i32>} : memref<2x8x128xf32, #tpu.memory_space<vmem>>, vector<2x8x128xf32>,
    } else {
    }
    return
  }
  func.func @transform_0(%arg0: i32) -> (i32, i32, i32) {
    %c0_i32 = arith.constant 0 : i32
    %c0_i32_0 = arith.constant 0 : i32
    %c0_i32_1 = arith.constant 0 : i32
    %c0_i32_2 = arith.constant 0 : i32
    return %c0_i32, %c0_i32_0, %c0_i32_1 : i32, i32, i32
  }
  func.func @transform_1(%arg0: i32) -> (i32, i32, i32) {
    %c0_i32 = arith.constant 0 : i32
    %c0_i32_0 = arith.constant 0 : i32
    %c0_i32_1 = arith.constant 0 : i32
    %c0_i32_2 = arith.constant 0 : i32
    return %c0_i32, %c0_i32_0, %c0_i32_1 : i32, i32, i32
  }
  func.func @transform_2(%arg0: i32) -> (i32, i32, i32) {
    %c0_i32 = arith.constant 0 : i32
    %c0_i32_0 = arith.constant 0 : i32
    %c0_i32_1 = arith.constant 0 : i32
    return %arg0, %c0_i32, %c0_i32_0 : i32, i32, i32
  }
  func.func @transform_3(%arg0: i32) -> (i32, i32, i32) {
    %c0_i32 = arith.constant 0 : i32
    %c0_i32_0 = arith.constant 0 : i32
    %c0_i32_1 = arith.constant 0 : i32
    return %arg0, %c0_i32, %c0_i32_0 : i32, i32, i32
  }
  func.func @transform_4(%arg0: i32) -> (i32, i32, i32) {
    %c0_i32 = arith.constant 0 : i32
    %c0_i32_0 = arith.constant 0 : i32
    %c0_i32_1 = arith.constant 0 : i32
    return %arg0, %c0_i32, %c0_i32_0 : i32, i32, i32
  }
  func.func @transform_5(%arg0: i32) -> (i32, i32, i32) {
    %c0_i32 = arith.constant 0 : i32
    %c0_i32_0 = arith.constant 0 : i32
    %c0_i32_1 = arith.constant 0 : i32
    return %arg0, %c0_i32, %c0_i32_0 : i32, i32, i32
  }
  func.func @transform_6(%arg0: i32) -> (i32, i32, i32) {
    %c0_i32 = arith.constant 0 : i32
    %c0_i32_0 = arith.constant 0 : i32
    %c0_i32_1 = arith.constant 0 : i32
    return %arg0, %c0_i32, %c0_i32_0 : i32, i32, i32
  }
  func.func @transform_7(%arg0: i32) -> (i32, i32, i32) {
    %c0_i32 = arith.constant 0 : i32
    %c0_i32_0 = arith.constant 0 : i32
    %c0_i32_1 = arith.constant 0 : i32
    return %arg0, %c0_i32, %c0_i32_0 : i32, i32, i32
  }
  func.func @transform_8(%arg0: i32) -> (i32, i32, i32) {
    %c0_i32 = arith.constant 0 : i32
    %c0_i32_0 = arith.constant 0 : i32
    %c0_i32_1 = arith.constant 0 : i32
    return %arg0, %c0_i32, %c0_i32_0 : i32, i32, i32
  }
  func.func @transform_9(%arg0: i32) -> (i32, i32, i32) {
    %c0_i32 = arith.constant 0 : i32
    %c0_i32_0 = arith.constant 0 : i32
    %c0_i32_1 = arith.constant 0 : i32
    return %arg0, %c0_i32, %c0_i32_0 : i32, i32, i32
  }
  func.func @transform_10(%arg0: i32) -> (i32, i32, i32) {
    %c0_i32 = arith.constant 0 : i32
    %c0_i32_0 = arith.constant 0 : i32
    %c0_i32_1 = arith.constant 0 : i32
    return %arg0, %c0_i32, %c0_i32_0 : i32, i32, i32
  }
  func.func @transform_11(%arg0: i32) -> (i32, i32, i32) {
    %c0_i32 = arith.constant 0 : i32
    %c0_i32_0 = arith.constant 0 : i32
    %c0_i32_1 = arith.constant 0 : i32
    return %arg0, %c0_i32, %c0_i32_0 : i32, i32, i32
  }
  func.func @transform_12(%arg0: i32) -> (i32, i32, i32) {
    %c0_i32 = arith.constant 0 : i32
    %c0_i32_0 = arith.constant 0 : i32
    %c0_i32_1 = arith.constant 0 : i32
    return %arg0, %c0_i32, %c0_i32_0 : i32, i32, i32
  }
  func.func @transform_13(%arg0: i32) -> (i32, i32, i32) {
    %c0_i32 = arith.constant 0 : i32
    %c0_i32_0 = arith.constant 0 : i32
    %c0_i32_1 = arith.constant 0 : i32
    return %arg0, %c0_i32, %c0_i32_0 : i32, i32, i32
  }
  func.func @transform_14(%arg0: i32) -> (i32, i32, i32) {
    %c0_i32 = arith.constant 0 : i32
    %c0_i32_0 = arith.constant 0 : i32
    %c0_i32_1 = arith.constant 0 : i32
    %c0_i32_2 = arith.constant 0 : i32
    return %c0_i32, %c0_i32_0, %c0_i32_1 : i32, i32, i32
  }
}

</mosaic_0001>

<bundles_post_ra>
// kernel: clipn_adapter_forward.1
= control target key start
LH: loop header
LB: loop body
LE: loop exit
PB: predicated region body
PF: predicated region fallthrough
CT: control target
= control target key end

     0   :  { %s5372_s0 = inlined_call_operand.hbm [shape: f32[4,8,128], index: 0, kind: input, shape index: {}]   ;;  %s5373_s1 = inlined_call_operand.hbm [shape: f32[2,8,128], index: 1, kind: input, shape index: {}]   ;;  %s5374_s2 = inlined_call_operand.vmem [shape: f32[2,1,128], index: 2, kind: input, shape index: {}]   ;;  %s5375_s3 = inlined_call_operand.vmem [shape: f32[2,1,128], index: 3, kind: input, shape index: {}]   ;;  %s5376_s4 = inlined_call_operand.hbm [shape: f32[2,128,384], index: 4, kind: input, shape index: {}]   ;;  %s5377_s5 = inlined_call_operand.vmem [shape: f32[2,1,384], index: 5, kind: input, shape index: {}]   ;;  %s5378_s6 = inlined_call_operand.hbm [shape: f32[2,128,128], index: 6, kind: input, shape index: {}]   ;;  %s5379_s7 = inlined_call_operand.vmem [shape: f32[2,1,128], index: 7, kind: input, shape index: {}]   ;;  %s5380_s8 = inlined_call_operand.vmem [shape: f32[2,1,128], index: 8, kind: input, shape index: {}]   ;;  %s5381_s9 = inlined_call_operand.vmem [shape: f32[2,1,128], index: 9, kind: input, shape index: {}]   ;;  %s5382_s10 = inlined_call_operand.hbm [shape: f32[2,128,512], index: 10, kind: input, shape index: {}]   ;;  %s5383_s11 = inlined_call_operand.hbm [shape: f32[2,1,512], index: 11, kind: input, shape index: {}]   ;;  %s5384_s12 = inlined_call_operand.hbm [shape: f32[2,512,128], index: 12, kind: input, shape index: {}]   ;;  %s5385_s13 = inlined_call_operand.hbm [shape: f32[2,1,128], index: 13, kind: input, shape index: {}]   ;;  %s5386_s14 = inlined_call_operand.hbm [shape: f32[2,8,128], index: 14, kind: output, shape index: {}]  }
   0x1   :  { %5407 = sst [smem:[#allocation22_spill]] %s5372_s0 }
   0x2   :  { %5408 = sst [smem:[#allocation23_spill]] %s5373_s1 }
   0x3   :  { %5409 = sst [smem:[#allocation24_spill]] %s5374_s2 }
   0x4   :  { %5410 = sst [smem:[#allocation25_spill]] %s5375_s3 }
   0x5   :  { %5411 = sst [smem:[#allocation26_spill]] %s5376_s4 }
   0x6   :  { %5412 = sst [smem:[#allocation27_spill]] %s5377_s5 }
   0x7   :  { %5413 = sst [smem:[#allocation28_spill]] %s5378_s6 }
   0x8   :  { %5414 = sst [smem:[#allocation29_spill]] %s5379_s7 }
   0x9   :  { %5415 = sst [smem:[#allocation30_spill]] %s5380_s8 }
   0xa   :  { %5416 = sst [smem:[#allocation31_spill]] %s5381_s9 }
   0xb   :  { %5417 = sst [smem:[#allocation32_spill]] %s5382_s10 }
   0xc   :  { %5418 = sst [smem:[#allocation33_spill]] %s5383_s11 }
   0xd   :  { %5419 = sst [smem:[#allocation34_spill]] %s5386_s14 }
   0xe   :  { %19 = vsyncpa [#allocation4], 0 }
   0xf   :  { %20 = vsyncpa [#allocation7], 0 }
  0x10   :  { %21 = vsyncpa [#allocation5], 0  ;;  %s4499_s29 = smov 0   ;;  %s4501_s30 = smov 0  }
  0x11   :  { %s4503_s15 = smov 0   ;;  %s4505_s16 = smov 0  }
  0x12 LB: > { %5420 = sst [smem:[#allocation19_spill]] %s4396_s15  ;;  %s4518_s17 = sadd.s32 4294967295, %s4400_s16   ;;  %s4400_s16 = sphi %s4505_s16, %s5468_s16   ;;  %s4396_s15 = sphi %s4503_s15, %s5470_s15   ;;  %s4392_s30 = sphi %s4501_s30, %s5472_s30   ;;  %s4388_s29 = sphi %s4499_s29, %s5471_s29  }
  0x13   : > { %s4521_s18 = sadd.s32 1, %s4400_s16   ;;  %s128_s20 = sadd.s32 1, %s4396_s15 }
  0x14   : > { %5421 = sst [smem:[#allocation20_spill]] %s4521_s18  ;;  %s125_s19 = ssub.s32 %s4400_s16, %s4521_s18 }
  0x15   : > { %p126_p0 = scmp.eq.s32.totalorder %s125_s19, 0  ;;  %p135_p1 = scmp.ne.s32.totalorder %s4396_s15, %s4392_s30 }
  0x16   : > { %p136_p2 = scmp.eq.s32.totalorder %s4400_s16, 0  ;;  %p141_p3 = scmp.ne.s32.totalorder %s4392_s30, %s4388_s29 }
  0x17   : > { %s4531_s21 = scalar_select %p126_p0, %s4396_s15, %s128_s20  }
  0x18   : > { %p4533_p4 = por %p136_p2, %p135_p1  ;;  %p5391_p5 = scmp.eq.s32.totalorder %s4518_s17, 0 }
  0x19   : > { %5422 = sst [smem:[#allocation21_spill]] %s4531_s21  ;;  %p3313_p6 = scmp.ge.s32.totalorder %s4400_s16, 1 }
  0x1a   : > { %p407_p7 = scmp.lt.s32.totalorder %s4400_s16, 3  ;;  %p4542_p8 = por %p5391_p5, %p141_p3 }
  0x1b   : > { %s4402_s25 = smov [#allocation3]   ;;  %p3952_p13 = scmp.lt.s32.totalorder %s4400_s16, 2 }
  0x1c   : > { %s5424_s23 = scalar_select %p4542_p8, 1, 0 }
  0x1d   : > { %p4547_p10 = pnand %p3313_p6, %p407_p7  ;;  %s419_s26 = sshll.u32 %s4402_s25, 4  ;;  %s420_s26 = int_to_ptr.vmem [resolvable:$true] %s419_s26 }
  0x1e   : > { %s4562_s29 = sand.u32 1, %s4396_s15   ;;  %p4566_p0 = pnand %p3952_p13, %p4533_p4 }
  0x1f   : > { %s5425_s24 = scalar_select %p4547_p10, 1, 0 }
  0x20   : > { %p3924_p11 = pneg %p4547_p10  ;;  %s5428_s0 = sld [smem:[#allocation22_spill]] }
  0x21   : > { %s5427_s19 = scalar_select %p4566_p0, 1, 0 }
  0x22   : > { %p4555_p12 = pnand %p3924_p11, %p5391_p5 }
  0x24   : > { %s5426_s27 = scalar_select %p4555_p12, 1, 0 }
  0x25   : > { %p5395_p2 = pneg %p4555_p12 }
  0x26   : > { %s4092_s21 = scalar_lea.hbm %s5428_s0, 512 }
  0x27   : > { %p4093_p1 = scmp.ne.s32.totalorder %s5428_s0, %s4092_s21  ;;  %p4099_p4 = scmp.lt.u32.totalorder %s4092_s21, %s5428_s0 }
  0x29   : > { %p4095_p3 = pnand %p5395_p2, %p4093_p1 }
  0x2b   : > { %p4096_p6 = pneg %p4095_p3 }
  0x2d   : > { %p4101_p7 = pnand %p4099_p4, %p4096_p6 }
  0x2f   : > { %4104 = shalt.err (!%p4101_p7)
}
  0x30   : > { %s4105_s15 = scalar_lea.vmem %s420_s26, 512  ;;  %p4113_p5 = scmp.lt.s32.totalorder %s420_s26, %s420_s26 }
  0x31   : > { %p4106_p11 = scmp.ne.s32.totalorder %s420_s26, %s4105_s15  ;;  %p4114_p8 = scmp.lt.s32.totalorder %s4105_s15, %s4105_s15 }
  0x33   : > { %p4108_p13 = pnand %p4106_p11, %p5395_p2  ;;  %p4115_p10 = por %p4114_p8, %p4113_p5 }
  0x35   : > { %p4109_p9 = pneg %p4108_p13 }
  0x37   : > { %p4116_p0 = pnand %p4115_p10, %p4109_p9 }
  0x39   : > { %4119 = shalt.err (!%p4116_p0)
}
  0x3a   : > { %s5398_s14 = smov 128   ;;  %s5400_s18 = smov 8  }
  0x3b   : > { %3927 = dma.hbm_to_vmem [thread:$0]  (!%p4555_p12), %s5428_s0, 512, %s420_s26, [#allocation4], %s5398_s14, %s5398_s14, %s5400_s18  }
  0x3c   : > { %s3896_s15 = smul.u32 384, %s4562_s29  ;;  %s3318_s25 = sshll.u32 %s4562_s29, 7 }
  0x3d   : > { %s3897_s20 = smul.u32 6144, %s4400_s16  ;;  %s5429_s4 = sld [smem:[#allocation26_spill]] }
  0x3e   : > { %s462_s8 = scalar_lea.vmem [#allocation8], %s3896_s15  ;;  %s5430_s3 = sand.u32 1, %s4400_s16  }
  0x3f   : > { %s469_s7 = sshll.u32 %s462_s8, 4  ;;  %s4607_s2 = scalar_lea.sflag [#allocation4], %s5430_s3  ;;  %s4603_s7 = int_to_ptr.vmem [resolvable:$true] %s469_s7 }
  0x40   : > { %p5431_p8 = scmp.ne.s32.totalorder %s5427_s19, 0 }
  0x42   : > { %p4613_p9 = pneg %p5431_p8 }
  0x43   : > { %s4601_s9 = scalar_lea.hbm %s5429_s4, %s3897_s20  ;;  %s4125_s8 = scalar_lea.hbm %s5429_s4, 12288 }
  0x44   : > { %s4120_s26 = scalar_lea.hbm %s4601_s9, 6144  ;;  %p4126_p1 = scmp.lt.u32.totalorder %s4601_s9, %s5429_s4 }
  0x45   : > { %p4121_p5 = scmp.ne.s32.totalorder %s4601_s9, %s4120_s26  ;;  %p4127_p3 = scmp.lt.u32.totalorder %s4125_s8, %s4120_s26 }
  0x46   : > { %s5432_s21 = scalar_select %p4613_p9, 1, 0 }
  0x47   : > { %p4123_p10 = pnand %p4613_p9, %p4121_p5  ;;  %p4128_p6 = por %p4127_p3, %p4126_p1 }
  0x48   : > { %p4129_p4 = scmp.lt.u32.totalorder %s4120_s26, %s4601_s9 }
  0x49   : > { %p4124_p0 = pneg %p4123_p10 }
  0x4a   : > { %p4130_p7 = por %p4129_p4, %p4128_p6 }
  0x4c   : > { %p4131_p11 = pnand %p4130_p7, %p4124_p0 }
  0x4e   : > { %4134 = shalt.err (!%p4131_p11)
}
  0x4f   : > { %s4135_s3 = scalar_lea.vmem %s4603_s7, 6144  ;;  %s4405_s22 = smov [#allocation8]  }
  0x50   : > { %p4136_p13 = scmp.ne.s32.totalorder %s4603_s7, %s4135_s3  ;;  %s4140_s5 = sshll.u32 %s4405_s22, 4  ;;  %s4141_s5 = int_to_ptr.vmem [resolvable:$false] %s4140_s5 }
  0x51   : > { %s4142_s28 = scalar_lea.vmem %s4141_s5, 12288  ;;  %p4143_p2 = scmp.lt.s32.totalorder %s4603_s7, %s4141_s5 }
  0x52   : > { %p4138_p5 = pnand %p4136_p13, %p4613_p9  ;;  %p4144_p12 = scmp.lt.s32.totalorder %s4142_s28, %s4135_s3 }
  0x54   : > { %p4139_p10 = pneg %p4138_p5  ;;  %p4145_p1 = por %p4144_p12, %p4143_p2 }
  0x56   : > { %p4146_p3 = pnand %p4145_p1, %p4139_p10 }
  0x58   : > { %4149 = shalt.err (!%p4146_p3)
}
  0x59   : > { %s4406_s26 = smov 384   ;;  %s4407_s8 = smov 24  }
  0x5a   : > { %3934 = dma.hbm_to_vmem [thread:$0]  (!%p5431_p8), %s4601_s9, 6144, %s4603_s7, %s4607_s2, %s4406_s26, %s4406_s26, %s4407_s8  }
  0x5b   : > { %s3374_s15 = sshll.u32 %s4400_s16, 11  ;;  %s490_s20 = scalar_lea.vmem [#allocation9], %s3318_s25 }
  0x5c   : > { %s497_s22 = sshll.u32 %s490_s20, 4  ;;  %s5433_s6 = sld [smem:[#allocation28_spill]]  ;;  %s4645_s22 = int_to_ptr.vmem [resolvable:$true] %s497_s22 }
  0x62   : > { %s4643_s28 = scalar_lea.hbm %s5433_s6, %s3374_s15  ;;  %s4155_s25 = scalar_lea.hbm %s5433_s6, 4096 }
  0x63   : > { %s4150_s14 = scalar_lea.hbm %s4643_s28, 2048  ;;  %p4156_p6 = scmp.lt.u32.totalorder %s4643_s28, %s5433_s6 }
  0x64   : > { %p4151_p12 = scmp.ne.s32.totalorder %s4643_s28, %s4150_s14  ;;  %p4157_p4 = scmp.lt.u32.totalorder %s4155_s25, %s4150_s14 }
  0x65   : > { %p4159_p11 = scmp.lt.u32.totalorder %s4150_s14, %s4643_s28 }
  0x66   : > { %p4153_p2 = pnand %p4151_p12, %p4613_p9  ;;  %p4158_p7 = por %p4157_p4, %p4156_p6 }
  0x68   : > { %p4154_p0 = pneg %p4153_p2  ;;  %p4160_p13 = por %p4159_p11, %p4158_p7 }
  0x6a   : > { %p4161_p5 = pnand %p4160_p13, %p4154_p0 }
  0x6c   : > { %4164 = shalt.err (!%p4161_p5)
}
  0x6d   : > { %s4165_s15 = scalar_lea.vmem %s4645_s22, 2048  ;;  %s4408_s20 = smov [#allocation9]  }
  0x6e   : > { %p4166_p10 = scmp.ne.s32.totalorder %s4645_s22, %s4165_s15  ;;  %s4170_s5 = sshll.u32 %s4408_s20, 4  ;;  %s4171_s5 = int_to_ptr.vmem [resolvable:$false] %s4170_s5 }
  0x6f   : > { %s4172_s3 = scalar_lea.vmem %s4171_s5, 4096  ;;  %p4173_p12 = scmp.lt.s32.totalorder %s4645_s22, %s4171_s5 }
  0x70   : > { %p4168_p1 = pnand %p4166_p10, %p4613_p9  ;;  %p4174_p2 = scmp.lt.s32.totalorder %s4172_s3, %s4165_s15 }
  0x72   : > { %p4169_p3 = pneg %p4168_p1  ;;  %p4175_p6 = por %p4174_p2, %p4173_p12 }
  0x74   : > { %p4176_p4 = pnand %p4175_p6, %p4169_p3 }
  0x76   : > { %4179 = shalt.err (!%p4176_p4)
}
  0x77   : > { %s5434_s14 = smov 128   ;;  %s5402_s7 = sshll.u32 %s4562_s29, 9 }
  0x78   : > { %3937 = dma.hbm_to_vmem [thread:$0]  (!%p5431_p8), %s4643_s28, 2048, %s4645_s22, %s4607_s2, %s5434_s14, %s5434_s14, %s5400_s18  }
  0x79   : > { %s3375_s9 = sshll.u32 %s4400_s16, 13  ;;  %s5435_s10 = sld [smem:[#allocation32_spill]] }
  0x7a   : > { %s529_s15 = scalar_lea.vmem [#allocation10], %s5402_s7 }
  0x7b   : > { %s536_s20 = sshll.u32 %s529_s15, 4  ;;  %s4683_s20 = int_to_ptr.vmem [resolvable:$true] %s536_s20 }
  0x7f   : > { %s4679_s8 = scalar_lea.hbm %s5435_s10, %s3375_s9  ;;  %s4185_s3 = scalar_lea.hbm %s5435_s10, 16384 }
  0x80   : > { %s4180_s5 = scalar_lea.hbm %s4679_s8, 8192  ;;  %p4186_p13 = scmp.lt.u32.totalorder %s4679_s8, %s5435_s10 }
  0x81   : > { %p4181_p0 = scmp.ne.s32.totalorder %s4679_s8, %s4180_s5  ;;  %p4187_p5 = scmp.lt.u32.totalorder %s4185_s3, %s4180_s5 }
  0x82   : > { %p4189_p1 = scmp.lt.u32.totalorder %s4180_s5, %s4679_s8 }
  0x83   : > { %p4183_p7 = pnand %p4181_p0, %p4613_p9  ;;  %p4188_p10 = por %p4187_p5, %p4186_p13 }
  0x85   : > { %p4184_p11 = pneg %p4183_p7  ;;  %p4190_p3 = por %p4189_p1, %p4188_p10 }
  0x87   : > { %p4191_p12 = pnand %p4190_p3, %p4184_p11 }
  0x89   : > { %4194 = shalt.err (!%p4191_p12)
}
  0x8a   : > { %s4195_s15 = scalar_lea.vmem %s4683_s20, 8192  ;;  %s4409_s22 = smov [#allocation10]  }
  0x8b   : > { %p4196_p2 = scmp.ne.s32.totalorder %s4683_s20, %s4195_s15  ;;  %s4200_s28 = sshll.u32 %s4409_s22, 4  ;;  %s4201_s28 = int_to_ptr.vmem [resolvable:$false] %s4200_s28 }
  0x8c   : > { %s4202_s25 = scalar_lea.vmem %s4201_s28, 16384  ;;  %p4203_p0 = scmp.lt.s32.totalorder %s4683_s20, %s4201_s28 }
  0x8d   : > { %p4198_p6 = pnand %p4196_p2, %p4613_p9  ;;  %p4204_p7 = scmp.lt.s32.totalorder %s4202_s25, %s4195_s15 }
  0x8f   : > { %p4199_p4 = pneg %p4198_p6  ;;  %p4205_p13 = por %p4204_p7, %p4203_p0 }
  0x91   : > { %p4206_p5 = pnand %p4205_p13, %p4199_p4 }
  0x93   : > { %4209 = shalt.err (!%p4206_p5)
}
  0x94   : > { %s4410_s5 = smov 512   ;;  %s4411_s3 = smov 32  }
  0x95   : > { %3940 = dma.hbm_to_vmem [thread:$0]  (!%p5431_p8), %s4679_s8, 8192, %s4683_s20, %s4607_s2, %s4410_s5, %s4410_s5, %s4411_s3  }
  0x96   : > { %s3324_s26 = sshll.u32 %s4562_s29, 2  ;;  %s3376_s22 = sshll.u32 %s4400_s16, 6 }
  0x97   : > { %s5436_s11 = sld [smem:[#allocation33_spill]]  ;;  %s550_s25 = scalar_lea.vmem [#allocation11], %s3324_s26 }
  0x98   : > { %s558_s7 = sshll.u32 %s550_s25, 4  ;;  %s4719_s6 = scalar_lea.hbm %s5384_s12, %s3375_s9  ;;  %s559_s7 = int_to_ptr.vmem [resolvable:$true] %s558_s7 }
  0x9d   : > { %s4712_s15 = scalar_lea.hbm %s5436_s11, %s3376_s22  ;;  %s4215_s5 = scalar_lea.hbm %s5436_s11, 128 }
  0x9e   : > { %s4210_s8 = scalar_lea.hbm %s4712_s15, 64  ;;  %p4216_p3 = scmp.lt.u32.totalorder %s4712_s15, %s5436_s11 }
  0x9f   : > { %p4211_p11 = scmp.ne.s32.totalorder %s4712_s15, %s4210_s8  ;;  %p4217_p12 = scmp.lt.u32.totalorder %s4215_s5, %s4210_s8 }
  0xa0   : > { %p4219_p6 = scmp.lt.u32.totalorder %s4210_s8, %s4712_s15 }
  0xa1   : > { %p4213_p10 = pnand %p4211_p11, %p4613_p9  ;;  %p4218_p2 = por %p4217_p12, %p4216_p3 }
  0xa3   : > { %p4214_p1 = pneg %p4213_p10  ;;  %p4220_p4 = por %p4219_p6, %p4218_p2 }
  0xa5   : > { %p4221_p0 = pnand %p4220_p4, %p4214_p1 }
  0xa7   : > { %4224 = shalt.err (!%p4221_p0)
}
  0xa8   : > { %s4225_s0 = scalar_lea.vmem %s559_s7, 64  ;;  %s4412_s4 = smov [#allocation11]  }
  0xa9   : > { %p4226_p7 = scmp.ne.s32.totalorder %s559_s7, %s4225_s0  ;;  %s4230_s9 = sshll.u32 %s4412_s4, 4  ;;  %s4231_s9 = int_to_ptr.vmem [resolvable:$false] %s4230_s9 }
  0xaa   : > { %s4232_s26 = scalar_lea.vmem %s4231_s9, 128  ;;  %p4233_p11 = scmp.lt.s32.totalorder %s559_s7, %s4231_s9 }
  0xab   : > { %p4228_p13 = pnand %p4226_p7, %p4613_p9  ;;  %p4234_p10 = scmp.lt.s32.totalorder %s4232_s26, %s4225_s0 }
  0xad   : > { %p4229_p5 = pneg %p4228_p13  ;;  %p4235_p8 = por %p4234_p10, %p4233_p11 }
  0xaf   : > { %p4236_p3 = pnand %p4235_p8, %p4229_p5 }
  0xb1   : > { %4239 = shalt.err (!%p4236_p3)
}
  0xb2   : > { %p5437_p12 = scmp.ne.s32.totalorder %s5427_s19, 0  ;;  %s5438_s28 = sshll.u32 %s4562_s29, 9 }
  0xb3   : > { %s569_s25 = scalar_lea.vmem [#allocation12], %s5438_s28  ;;  %s4413_s18 = smov [#allocation6]  }
  0xb4   : > { %3943 = dma.hbm_to_vmem [thread:$0]  (!%p5437_p12), %s4712_s15, 64, %s559_s7, %s4607_s2  }
  0xb5   : > { %s576_s8 = sshll.u32 %s569_s25, 4  ;;  %s4743_s20 = sshll.u32 %s4413_s18, 4  ;;  %s4741_s8 = int_to_ptr.vmem [resolvable:$true] %s576_s8  ;;  %s433_s20 = int_to_ptr.vmem [resolvable:$true] %s4743_s20 }
  0xb6   : > { %s4240_s5 = scalar_lea.hbm %s4719_s6, 8192  ;;  %s4245_s0 = scalar_lea.hbm %s5384_s12, 16384 }
  0xb7   : > { %p4241_p8 = scmp.ne.s32.totalorder %s4719_s6, %s4240_s5  ;;  %p4246_p6 = scmp.lt.u32.totalorder %s4719_s6, %s5384_s12 }
  0xb8   : > { %p4247_p4 = scmp.lt.u32.totalorder %s4245_s0, %s4240_s5  ;;  %p4249_p7 = scmp.lt.u32.totalorder %s4240_s5, %s4719_s6 }
  0xb9   : > { %p4243_p1 = pnand %p4241_p8, %p4613_p9 }
  0xba   : > { %p4248_p0 = por %p4247_p4, %p4246_p6 }
  0xbb   : > { %p4244_p2 = pneg %p4243_p1 }
  0xbc   : > { %p4250_p13 = por %p4249_p7, %p4248_p0 }
  0xbe   : > { %p4251_p5 = pnand %p4250_p13, %p4244_p2 }
  0xc0   : > { %4254 = shalt.err (!%p4251_p5)
}
  0xc1   : > { %s4255_s7 = scalar_lea.vmem %s4741_s8, 8192  ;;  %s4414_s15 = smov [#allocation12]  }
  0xc2   : > { %p4256_p11 = scmp.ne.s32.totalorder %s4741_s8, %s4255_s7  ;;  %s4260_s26 = sshll.u32 %s4414_s15, 4  ;;  %s4261_s26 = int_to_ptr.vmem [resolvable:$false] %s4260_s26 }
  0xc3   : > { %s4262_s28 = scalar_lea.vmem %s4261_s26, 16384  ;;  %p4263_p8 = scmp.lt.s32.totalorder %s4741_s8, %s4261_s26 }
  0xc4   : > { %p4258_p10 = pnand %p4256_p11, %p4613_p9  ;;  %p4264_p1 = scmp.lt.s32.totalorder %s4262_s28, %s4255_s7 }
  0xc6   : > { %p4259_p3 = pneg %p4258_p10  ;;  %p4265_p6 = por %p4264_p1, %p4263_p8 }
  0xc8   : > { %p4266_p4 = pnand %p4265_p6, %p4259_p3 }
  0xca   : > { %4269 = shalt.err (!%p4266_p4)
}
  0xcb   : > { %s5439_s25 = smov 8   ;;  %s5440_s1 = sld [smem:[#allocation23_spill]] }
  0xcc   : > { %3946 = dma.hbm_to_vmem [thread:$0]  (!%p5437_p12), %s4719_s6, 8192, %s4741_s8, %s4607_s2, %s5434_s14, %s5434_s14, %s5439_s25  }
  0xcd   : > { %p5441_p0 = scmp.ne.s32.totalorder %s5426_s27, 0 }
  0xcf   : > { %p5442_p7 = pneg %p5441_p0 }
  0xd1   : > { %s4270_s3 = scalar_lea.hbm %s5440_s1, 256 }
  0xd2   : > { %p4271_p2 = scmp.ne.s32.totalorder %s5440_s1, %s4270_s3  ;;  %p4277_p11 = scmp.lt.u32.totalorder %s4270_s3, %s5440_s1 }
  0xd4   : > { %p4273_p13 = pnand %p4271_p2, %p5442_p7 }
  0xd6   : > { %p4274_p5 = pneg %p4273_p13 }
  0xd8   : > { %p4279_p10 = pnand %p4277_p11, %p4274_p5 }
  0xda   : > { %4282 = shalt.err (!%p4279_p10)
}
  0xdb   : > { %s4283_s6 = scalar_lea.vmem %s433_s20, 256  ;;  %p5443_p8 = pmov %p5442_p7 }
  0xdc   : > { %p4284_p3 = scmp.ne.s32.totalorder %s433_s20, %s4283_s6  ;;  %p4291_p4 = scmp.lt.s32.totalorder %s433_s20, %s433_s20 }
  0xdd   : > { %p4292_p12 = scmp.lt.s32.totalorder %s4283_s6, %s4283_s6 }
  0xde   : > { %p4286_p1 = pnand %p4284_p3, %p5443_p8 }
  0xdf   : > { %p4293_p9 = por %p4292_p12, %p4291_p4 }
  0xe0   : > { %p4287_p6 = pneg %p4286_p1 }
  0xe2   : > { %p4294_p2 = pnand %p4293_p9, %p4287_p6 }
  0xe4   : > { %4297 = shalt.err (!%p4294_p2)
}
  0xe5   : > { %3930 = dma.hbm_to_vmem [thread:$0]  (!%p5441_p0), %s5440_s1, 256, %s433_s20, [#allocation7], %s5434_s14, %s5434_s14, %s5439_s25  }
  0xe6   : > { %s3330_s15 = sshll.u32 %s4400_s16, 4  ;;  %s589_s26 = scalar_lea.vmem [#allocation13], %s4562_s29 }
  0xe7   : > { %s596_s28 = sshll.u32 %s589_s26, 4  ;;  %s594_s3 = scalar_lea.hbm %s5385_s13, %s3330_s15  ;;  %s597_s28 = int_to_ptr.vmem [resolvable:$true] %s596_s28 }
  0xe8   : > { %s4298_s22 = scalar_lea.hbm %s594_s3, 16  ;;  %p5444_p12 = scmp.ne.s32.totalorder %s5432_s21, 0 }
  0xe9   : > { %p4299_p9 = scmp.ne.s32.totalorder %s594_s3, %s4298_s22  ;;  %s4303_s4 = scalar_lea.hbm %s5385_s13, 32 }
  0xea   : > { %p4304_p0 = scmp.lt.u32.totalorder %s594_s3, %s5385_s13  ;;  %p4305_p5 = scmp.lt.u32.totalorder %s4303_s4, %s4298_s22 }
  0xeb   : > { %p4301_p7 = pnand %p4299_p9, %p5444_p12  ;;  %p4307_p10 = scmp.lt.u32.totalorder %s4298_s22, %s594_s3 }
  0xec   : > { %p4306_p11 = por %p4305_p5, %p4304_p0 }
  0xed   : > { %p4302_p13 = pneg %p4301_p7 }
  0xee   : > { %p4308_p3 = por %p4307_p10, %p4306_p11 }
  0xf0   : > { %p4309_p8 = pnand %p4308_p3, %p4302_p13 }
  0xf2   : > { %4312 = shalt.err (!%p4309_p8)
}
  0xf3   : > { %s4313_s16 = scalar_lea.vmem %s597_s28, 16  ;;  %s4415_s29 = smov [#allocation13]  }
  0xf4   : > { %p4314_p1 = scmp.ne.s32.totalorder %s597_s28, %s4313_s16  ;;  %s4318_s14 = sshll.u32 %s4415_s29, 4  ;;  %s4319_s14 = int_to_ptr.vmem [resolvable:$false] %s4318_s14 }
  0xf5   : > { %s4320_s20 = scalar_lea.vmem %s4319_s14, 32  ;;  %p4321_p2 = scmp.lt.s32.totalorder %s597_s28, %s4319_s14 }
  0xf6   : > { %p4316_p6 = pnand %p4314_p1, %p5444_p12  ;;  %p4322_p9 = scmp.lt.s32.totalorder %s4320_s20, %s4313_s16 }
  0xf8   : > { %p4317_p4 = pneg %p4316_p6  ;;  %p4323_p7 = por %p4322_p9, %p4321_p2 }
  0xfa   : > { %p4324_p0 = pnand %p4323_p7, %p4317_p4 }
  0xfc   : > { %4327 = shalt.err (!%p4324_p0)
}
  0xfd   : > { %p5445_p5 = scmp.ne.s32.totalorder %s5427_s19, 0  ;;  %p5446_p13 = scmp.ne.s32.totalorder %s5425_s24, 0 }
  0xfe   : > { %p5447_p11 = scmp.eq.s32.totalorder (!%p5446_p13), %s4518_s17, 0 }
  0xff   : > { %3949 = dma.hbm_to_vmem [thread:$0]  (!%p5445_p5), %s594_s3, 16, %s597_s28, %s4607_s2  }
 0x100   : > { %605 = sbr.rel (%p5446_p13) target bundleno = 2864 (0xb30), region = 76 }
 0x107   : > { %4371 = dma.done.wait (%p5447_p11), [#allocation4], 512   ;;  %p5448_p12 = pmov %p5447_p11 }
 0x108   : > { %p5449_p10 = pmov %p5447_p11 }
 0x109   : > { %4373 = vsyncadd (%p5448_p12), [#allocation4], 4294966784 }
 0x10a   : > { %4375 = dma.done.wait (%p5449_p10), [#allocation7], 256   ;;  %p5450_p3 = pmov %p5449_p10 }
 0x10b   : > { %s615_s19 = sand.u32 1, %s4518_s17   ;;  %s4824_s2 = sand.u32 1, %s4392_s30  }
 0x10c   : > { %4377 = vsyncadd (%p5450_p3), [#allocation7], 4294967040  ;;  %s3898_s24 = smul.u32 384, %s4824_s2  ;;  %s616_s21 = scalar_lea.sflag [#allocation4], %s615_s19 }
 0x10d   : > { %p5451_p8 = scmp.ne.s32.totalorder %s5424_s23, 0 }
 0x10e   : > { %s4827_s25 = scalar_lea.vmem [#allocation8], %s3898_s24 }
 0x10f   : > { %4379 = dma.done.wait (%p5451_p8), %s616_s21, 24656  }
 0x110   : > { %4381 = vsyncadd (%p5451_p8), %s616_s21, 4294942640  ;;  %s3334_s8 = sshll.u32 %s4824_s2, 7  ;;  %s3335_s7 = sshll.u32 %s4824_s2, 9 }
 0x111   : > { %s3336_s15 = sshll.u32 %s4824_s2, 2  ;;  %p746_p1 = scmp.lt.s32.totalorder %s4518_s17, 1 }
 0x112   : > { %s5453_s27 = sld [smem:[#allocation25_spill]]  ;;  %s5454_s16 = sld [smem:[#allocation29_spill]] }
 0x113   : > { %s4838_s26 = scalar_select %p746_p1, %s4518_s17, 1 }
 0x114   : > { %s5455_s19 = sld [smem:[#allocation30_spill]]  ;;  %s5456_s18 = sld [smem:[#allocation31_spill]] }
 0x115   : > { %s3899_s4 = smul.u32 3, %s4838_s26  ;;  %s5457_s5 = sld [smem:[#allocation27_spill]] }
 0x116   : > { %s4866_s3 = scalar_lea.vmem [#allocation9], %s3334_s8  ;;  %s4868_s22 = scalar_lea.vmem [#allocation10], %s3335_s7 }
 0x117   : > { %s4872_s9 = scalar_lea.vmem [#allocation12], %s3335_s7  ;;  %s663_s6 = scalar_lea.vmem [#allocation13], %s4824_s2 }
 0x118   : > { %s751_s0 = scalar_lea.vmem %s5453_s27, %s4838_s26  ;;  %s758_s29 = scalar_lea.vmem %s5454_s16, %s4838_s26 }
 0x119   : > { %s4870_s27 = scalar_lea.vmem [#allocation11], %s3336_s15  ;;  %p5458_p6 = scmp.ne.s32.totalorder %s4518_s17, 0 }
 0x11a   : > { %s761_s24 = scalar_lea.vmem %s5455_s19, %s4838_s26  ;;  %s764_s1 = scalar_lea.vmem %s5456_s18, %s4838_s26  ;;  %v769_v0 = vld [vmem:[#allocation3] sm:$0xff] (!%p5458_p6)  ;;  %v770_v1 = vld [vmem:[#allocation3 + $0x8] sm:$0xff] (!%p5458_p6)  ;;  %v771_v2 = vld [vmem:[#allocation3 + $0x10] sm:$0xff] (!%p5458_p6) }
 0x11b   : > { %s4864_s23 = scalar_lea.vmem %s5457_s5, %s3899_s4  ;;  %768 = sbr.rel (%p5458_p6) target bundleno = 294 (0x126), region = 112  ;;  %v773_v3 = vadd.f32 (!%p5458_p6), %v770_v1, %v769_v0  ;;  %v772_v4 = vld [vmem:[#allocation3 + $0x18] sm:$0xff] (!%p5458_p6)  ;;  %v778_v7 = vld [vmem:[#allocation6] sm:$0xff] (!%p5458_p6)  ;;  %v779_v8 = vld [vmem:[#allocation6 + $0x8] sm:$0xff] (!%p5458_p6) }
 0x11d   : > { %v774_v5 = vadd.f32 (!%p5458_p6), %v773_v3, %v771_v2 }
 0x11f   : > { %v775_v6 = vadd.f32 (!%p5458_p6), %v774_v5, %v772_v4 }
 0x121   : > { %v777_v9 = vmul.f32 (!%p5458_p6), 0.25, %v775_v6 }
 0x123   : > { %v780_v10 = vadd.f32 %v778_v7, %v777_v9  ;;  %v781_v11 = vadd.f32 %v779_v8, %v777_v9 }
 0x125   : > { %782 = vst [vmem:[#allocation2] sm:$0xff] %v780_v10  ;;  %783 = vst [vmem:[#allocation2 + $0x8] sm:$0xff] %v781_v11 }
 0x126 PF: > { %v828_v14 = vld [vmem:[%s4827_s25 + $0x8] sm:$0xff]  ;;  %v831_v15 = vld [vmem:[%s4827_s25 + $0x20] sm:$0xff]  ;;  %v830_v18 = vld [vmem:[%s4827_s25 + $0x18] sm:$0xff]  ;;  %vm4417_vm0 = vmmov 0   ;;  %vm1092_vm1 = vcmask 261120   ;;  %s4420_s16 = smov 32  }
 0x127   : > { %v827_v16 = vld [vmem:[%s4827_s25] sm:$0xff]  ;;  %v3672_v17 = vpack.c.bf16 %v831_v15, %v828_v14  ;;  %v834_v19 = vld [vmem:[%s4827_s25 + $0x38] sm:$0xff]  ;;  %v837_v20 = vld [vmem:[%s4827_s25 + $0x50] sm:$0xff]  ;;  %vm1708_vm3 = vcmask 64512   ;;  %vm2407_vm4 = vcmask 523264   ;;  %vm2410_vm5 = vcmask 785408  }
 0x128   : > { %v3674_v21 = vpack.c.bf16 %v830_v18, %v827_v16  ;;  %v3676_v22 = vpack.c.bf16 %v837_v20, %v834_v19  ;;  %v829_v23 = vld [vmem:[%s4827_s25 + $0x10] sm:$0xff]  ;;  %v832_v24 = vld [vmem:[%s4827_s25 + $0x28] sm:$0xff]  ;;  %v843_v29 = vld [vmem:[%s4827_s25 + $0x80] sm:$0xff]  ;;  %v4416_v18 = vmov 0.0   ;;  %p3369_p4 = scmp.ne.s32.totalorder %s4518_s17, 1 }
 0x129   : > { %v833_v25 = vld [vmem:[%s4827_s25 + $0x30] sm:$0xff]  ;;  %3673 = vmatprep.subr.bf16.mxu0 %v3672_v17  ;;  %v3704_v26 = vpack.c.bf16 %v832_v24, %v829_v23  ;;  %v836_v27 = vld [vmem:[%s4827_s25 + $0x48] sm:$0xff]  ;;  %v835_v31 = vld [vmem:[%s4827_s25 + $0x40] sm:$0xff]  ;;  %956 = vmatprep.mubr.f32.mxu0 %v4416_v18 }
 0x12a   : > { %v840_v28 = vld [vmem:[%s4827_s25 + $0x68] sm:$0xff]  ;;  %3675 = vmatpush1.bf16.msra.mxu0 %v3674_v21  ;;  %v3678_v30 = vpack.c.bf16 %v836_v27, %v833_v25  ;;  %v838_v32 = vld [vmem:[%s4827_s25 + $0x58] sm:$0xff]  ;;  %v839_v35 = vld [vmem:[%s4827_s25 + $0x60] sm:$0xff] }
 0x12b   : > { %3677 = vmatprep.subr.bf16.mxu0 %v3676_v22  ;;  %3705 = vmatprep.subr.bf16.mxu1 %v3704_v26  ;;  %v3680_v33 = vpack.c.bf16 %v843_v29, %v840_v28  ;;  %v3708_v34 = vpack.c.bf16 %v838_v32, %v835_v31  ;;  %v842_v36 = vld [vmem:[%s4827_s25 + $0x78] sm:$0xff]  ;;  %v849_v47 = vld [vmem:[%s4827_s25 + $0xb0] sm:$0xff]  ;;  %v844_v50 = vld [vmem:[%s4827_s25 + $0x88] sm:$0xff] }
 0x12c   : > { %v4877_v12 = vld [vmem:[#allocation2] sm:$0xff]  ;;  %v4880_v13 = vld [vmem:[#allocation2 + $0x8] sm:$0xff]  ;;  %3707 = vmatpush3.bf16.msra.mxu1 %v3704_v26  ;;  %v3682_v37 = vpack.c.bf16 %v842_v36, %v839_v35  ;;  %v846_v46 = vld [vmem:[%s4827_s25 + $0x98] sm:$0xff] }
 0x12d   : > { %788 = vadd.xlane.f32.xlu0 %v4877_v12  ;;  %3709 = vmatprep.subr.bf16.mxu1 %v3708_v34  ;;  %v841_v48 = vld [vmem:[%s4827_s25 + $0x70] sm:$0xff]  ;;  %v3684_v49 = vpack.c.bf16 %v849_v47, %v846_v46  ;;  %v848_v52 = vld [vmem:[%s4827_s25 + $0xa8] sm:$0xff]  ;;  %v855_v56 = vld [vmem:[%s4827_s25 + $0xe0] sm:$0xff] }
 0x12e   : > { %3679 = vmatpush1.bf16.msra.mxu0 %v3678_v30  ;;  %v845_v51 = vld [vmem:[%s4827_s25 + $0x90] sm:$0xff]  ;;  %v3712_v53 = vpack.c.bf16 %v844_v50, %v841_v48  ;;  %v852_v55 = vld [vmem:[%s4827_s25 + $0xc8] sm:$0xff]  ;;  %v847_v57 = vld [vmem:[%s4827_s25 + $0xa0] sm:$0xff] }
 0x12f   : > { %3681 = vmatprep.subr.bf16.mxu0 %v3680_v33  ;;  %v3686_v54 = vpack.c.bf16 %v848_v52, %v845_v51  ;;  %v3688_v58 = vpack.c.bf16 %v855_v56, %v852_v55  ;;  %v850_v59 = vld [vmem:[%s4827_s25 + $0xb8] sm:$0xff]  ;;  %v851_v60 = vld [vmem:[%s4827_s25 + $0xc0] sm:$0xff]  ;;  %v861_v1 = vld [vmem:[%s4827_s25 + $0x110] sm:$0xff] }
 0x130   : > { %3711 = vmatpush3.bf16.msra.mxu1 %v3708_v34  ;;  %v854_v61 = vld [vmem:[%s4827_s25 + $0xd8] sm:$0xff]  ;;  %v3716_v62 = vpack.c.bf16 %v850_v59, %v847_v57  ;;  %v853_v2 = vld [vmem:[%s4827_s25 + $0xd0] sm:$0xff]  ;;  %v856_v4 = vld [vmem:[%s4827_s25 + $0xe8] sm:$0xff] }
 0x131   : > { %790 = vadd.xlane.f32.xlu0 %v4880_v13  ;;  %3713 = vmatprep.subr.bf16.mxu1 %v3712_v53  ;;  %v3690_v63 = vpack.c.bf16 %v854_v61, %v851_v60  ;;  %v858_v0 = vld [vmem:[%s4827_s25 + $0xf8] sm:$0xff]  ;;  %v857_v5 = vld [vmem:[%s4827_s25 + $0xf0] sm:$0xff]  ;;  %v860_v6 = vld [vmem:[%s4827_s25 + $0x108] sm:$0xff]  ;;  %v3720_v7 = vpack.c.bf16 %v856_v4, %v853_v2 }
 0x132   : > { %3683 = vmatpush1.bf16.msra.mxu0 %v3682_v37  ;;  %v3692_v3 = vpack.c.bf16 %v861_v1, %v858_v0  ;;  %v3694_v8 = vpack.c.bf16 %v860_v6, %v857_v5  ;;  %v864_v9 = vld [vmem:[%s4827_s25 + $0x128] sm:$0xff]  ;;  %v867_v10 = vld [vmem:[%s4827_s25 + $0x140] sm:$0xff]  ;;  %v862_v15 = vld [vmem:[%s4827_s25 + $0x118] sm:$0xff] }
 0x133   : > { %3685 = vmatprep.subr.bf16.mxu0 %v3684_v49  ;;  %v859_v11 = vld [vmem:[%s4827_s25 + $0x100] sm:$0xff]  ;;  %v3696_v14 = vpack.c.bf16 %v867_v10, %v864_v9  ;;  %v866_v17 = vld [vmem:[%s4827_s25 + $0x138] sm:$0xff]  ;;  %v873_v22 = vld [vmem:[%s4827_s25 + $0x170] sm:$0xff] }
 0x134   : > { %3715 = vmatpush3.bf16.msra.mxu1 %v3712_v53  ;;  %v863_v16 = vld [vmem:[%s4827_s25 + $0x120] sm:$0xff]  ;;  %v3724_v19 = vpack.c.bf16 %v862_v15, %v859_v11  ;;  %v870_v21 = vld [vmem:[%s4827_s25 + $0x158] sm:$0xff]  ;;  %v865_v23 = vld [vmem:[%s4827_s25 + $0x130] sm:$0xff] }
 0x135   : > { %3717 = vmatprep.subr.bf16.mxu1 %v3716_v62  ;;  %v3698_v20 = vpack.c.bf16 %v866_v17, %v863_v16  ;;  %v3700_v24 = vpack.c.bf16 %v873_v22, %v870_v21  ;;  %v868_v25 = vld [vmem:[%s4827_s25 + $0x148] sm:$0xff]  ;;  %v869_v26 = vld [vmem:[%s4827_s25 + $0x150] sm:$0xff]  ;;  %v871_v30 = vld [vmem:[%s4827_s25 + $0x160] sm:$0xff] }
 0x136   : > { %3687 = vmatpush1.bf16.msra.mxu0 %v3686_v54  ;;  %v872_v27 = vld [vmem:[%s4827_s25 + $0x168] sm:$0xff]  ;;  %v3728_v28 = vpack.c.bf16 %v868_v25, %v865_v23  ;;  %v874_v31 = vld [vmem:[%s4827_s25 + $0x178] sm:$0xff]  ;;  %s5459_s25 = sld [smem:[#allocation24_spill]]  ;;  %v875_v52 = vld [vmem:[%s4864_s23] sm:$0x7]  ;;  %s4419_s23 = smov 64  }
 0x137   : > { %3689 = vmatprep.subr.bf16.mxu0 %v3688_v58  ;;  %v3702_v29 = vpack.c.bf16 %v872_v27, %v869_v26  ;;  %v3732_v32 = vpack.c.bf16 %v874_v31, %v871_v30 }
 0x138   : > { %3719 = vmatpush3.bf16.msra.mxu1 %v3716_v62 }
 0x139   : > { %3721 = vmatprep.subr.bf16.mxu1 %v3720_v7 }
 0x13a   : > { %3691 = vmatpush1.bf16.msra.mxu0 %v3690_v63 }
 0x13b   : > { %3693 = vmatprep.subr.bf16.mxu0 %v3692_v3 }
 0x13c   : > { %3723 = vmatpush3.bf16.msra.mxu1 %v3720_v7  ;;  %s5460_s8 = scalar_lea.vmem %s5459_s25, %s4838_s26 }
 0x13d   : > { %3725 = vmatprep.subr.bf16.mxu1 %v3724_v19 }
 0x13e   : > { %3695 = vmatpush1.bf16.msra.mxu0 %v3694_v8 }
 0x13f   : > { %3697 = vmatprep.subr.bf16.mxu0 %v3696_v14 }
 0x140   : > { %3727 = vmatpush3.bf16.msra.mxu1 %v3724_v19 }
 0x141   : > { %3729 = vmatprep.subr.bf16.mxu1 %v3728_v28 }
 0x142   : > { %3699 = vmatpush1.bf16.msra.mxu0 %v3698_v20 }
 0x143   : > { %3701 = vmatprep.subr.bf16.mxu0 %v3700_v24 }
 0x144   : > { %3731 = vmatpush3.bf16.msra.mxu1 %v3728_v28 }
 0x145   : > { %3733 = vmatprep.subr.bf16.mxu1 %v3732_v32 }
 0x146   : > { %3703 = vmatpush1.bf16.msra.mxu0 %v3702_v29 }
 0x147   : > { %3557 = vmatprep.subr.mxu0 %v4416_v18 }
 0x148   : > { %3735 = vmatpush3.bf16.msra.mxu1 %v3732_v32 }
 0x149   : > { %3587 = vmatprep.subr.mxu1 %v4416_v18 }
 0x1ba   : > { %v789_v38 = vpop.xlane.xlu0 %788 }
 0x1bb   : > { %v793_v39 = vmul.f32 0.0078125, %v789_v38 }
 0x1bd   : > { %v4900_v40 = vsub.f32 %v4877_v12, %v793_v39 }
 0x1be   : > { %v791_v41 = vpop.xlane.xlu0 %790 }
 0x1bf   : > { %v794_v42 = vmul.f32 0.0078125, %v791_v41  ;;  %v797_v43 = vmul.f32 %v4900_v40, %v4900_v40  ;;  %v3339_v41 = vld [vmem:[%s5460_s8] ss:$0 sm:$0xff] }
 0x1c1   : > { %v4905_v44 = vsub.f32 %v4880_v13, %v794_v42  ;;  %799 = vadd.xlane.f32.xlu1 %v797_v43  ;;  %v3340_v43 = vld [vmem:[%s751_s0] ss:$0 sm:$0xff]  ;;  %s4418_s0 = smov 96  }
 0x1c3   : > { %v798_v45 = vmul.f32 %v4905_v44, %v4905_v44 }
 0x1c5   : > { %801 = vadd.xlane.f32.xlu1 %v798_v45 }
 0x24e   : > { %v800_v33 = vpop.xlane.xlu1 %799 }
 0x24f   : > { %v803_v34 = vmul.f32 0.0078125, %v800_v33 }
 0x251   : > { %v805_v35 = vadd.f32 1e-05, %v803_v34 }
 0x252   : > { %v802_v36 = vpop.xlane.xlu1 %801 }
 0x253   : > { %4020 = vrsqrt.f32 %v805_v35  ;;  %v804_v37 = vmul.f32 0.0078125, %v802_v36 }
 0x255   : > { %v806_v38 = vadd.f32 1e-05, %v804_v37 }
 0x257   : > { %4022 = vrsqrt.f32 %v806_v38 }
 0x25d   : > { %v4021_v39 = vpop.eup %4020 }
 0x25e   : > { %v809_v42 = vmul.f32 %v4021_v39, %v4900_v40  ;;  %v877_v40 = vlaneseq }
 0x260   : > { %v817_v45 = vmul.f32 %v3339_v41, %v809_v42  ;;  %v4962_v51 = vshrl.u32 %v877_v40, 7  ;;  %v1696_v21 = vand.u32 127, %v877_v40 }
 0x261   : > { %v4023_v46 = vpop.eup %4022 }
 0x262   : > { %v825_v47 = vadd.f32 %v3340_v43, %v817_v45  ;;  %v810_v48 = vmul.f32 %v4023_v46, %v4905_v44  ;;  %v879_v44 = vsub.s32 0, %v4962_v51  ;;  %v883_v53 = vsub.s32 1, %v4962_v51 }
 0x263   : > { %v887_v7 = vsub.s32 2, %v4962_v51  ;;  %vm5039_vm2 = vcmp.le.s32.totalorder %v1696_v21, %v4962_v51 }
 0x264   : > { %957 = vmatmul.mubr.f32.vlgmr.msra.gmra.mrb[0].mxu0 %v825_v47  ;;  %3554 = vmatprep.mubr.f32.mxu1 %v825_v47  ;;  %v818_v49 = vmul.f32 %v3339_v41, %v810_v48  ;;  %v880_v54 = vrot.slane %v875_v52, %v879_v44  ;;  %v884_v55 = vrot.slane %v875_v52, %v883_v53 }
 0x265   : > { %962 = vmatprep.mubr.f32.mxu0 %v4416_v18  ;;  %v888_v10 = vrot.slane %v875_v52, %v887_v7 }
 0x266   : > { %v826_v50 = vadd.f32 %v3340_v43, %v818_v49 }
 0x268   : > { %963 = vmatmul.mubr.f32.gmra.mrb[2].mxu0 %v826_v50  ;;  %3555 = vmatmul.mubr.f32.vlgmr.msra.gmra.mrb[0].mxu1 %v826_v50 }
 0x269   : > { %3559 = vmatprep.mubr.msk.f32.mxu0 %vm4417_vm0, %v4416_v18  ;;  %3589 = vmatprep.mubr.msk.f32.mxu1 %vm4417_vm0, %v4416_v18 }
 0x337   : > { %v958_v56 = vpop.f32.mrb[0].mxu0 }
 0x338   : > { %v959_v57 = vadd.f32 %v958_v56, %v880_v54  ;;  %v960_v58 = vpop.f32.mrb[1].mxu0 }
 0x339   : > { %v961_v59 = vadd.f32 %v960_v58, %v884_v55 }
 0x33a   : > { %1046 = vrot.lane.b32.xlu1 %v959_v57, %s4418_s0 }
 0x33b   : > { %1060 = vrot.lane.b32.xlu0 %v961_v59, %s4418_s0  ;;  %v964_v60 = vpop.f32.mrb[2].mxu0  ;;  %v4973_v61 = vpop.f32.mrb[0].mxu1  ;;  %3558 = vmatpush3.xpose.msk.msra.mxu0 %vm1092_vm1, %v961_v59 }
 0x33c   : > { %v965_v62 = vadd.f32 %v964_v60, %v880_v54  ;;  %v966_v63 = vpop.f32.mrb[3].mxu0  ;;  %v1035_v0 = vpop.f32.mrb[1].mxu1  ;;  %3562 = vmatprep.subr.mxu0 %v4416_v18  ;;  %v5030_v19 = vadd.f32 %v4973_v61, %v888_v10 }
 0x33d   : > { %v967_v1 = vadd.f32 %v966_v63, %v884_v55  ;;  %v5013_v15 = vadd.f32 %v1035_v0, %v888_v10 }
 0x33e   : > { %3560 = vmatmul.mubr.msk.f32.vlgmr.msra.gmra.mrb[4].mxu0 %vm1092_vm1, %v959_v57  ;;  %1048 = vrot.lane.b32.xlu1 %v965_v62, %s4418_s0 }
 0x33f   : > { %1064 = vrot.lane.b32.xlu0 %v961_v59, %s4419_s23  ;;  %3563 = vmatpush3.xpose.msk.msra.mxu0 %vm1092_vm1, %v967_v1 }
 0x340   : > { %3564 = vmatprep.mubr.msk.f32.mxu0 %vm4417_vm0, %v4416_v18  ;;  %3567 = vmatprep.subr.mxu0 %v4416_v18 }
 0x342   : > { %1062 = vrot.lane.b32.xlu1 %v967_v1, %s4418_s0  ;;  %3565 = vmatmul.mubr.msk.f32.vlgmr.msra.gmra.mrb[6].mxu0 %vm1092_vm1, %v965_v62 }
 0x343   : > { %1066 = vrot.lane.b32.xlu0 %v967_v1, %s4419_s23  ;;  %3569 = vmatprep.mubr.msk.f32.mxu0 %vm4417_vm0, %v4416_v18 }
 0x346   : > { %1050 = vrot.lane.b32.xlu1 %v959_v57, %s4419_s23 }
 0x347   : > { %1068 = vrot.lane.b32.xlu0 %v961_v59, %s4420_s16 }
 0x34a   : > { %1052 = vrot.lane.b32.xlu1 %v965_v62, %s4419_s23 }
 0x34b   : > { %1054 = vrot.lane.b32.xlu0 %v959_v57, %s4420_s16 }
 0x34e   : > { %1070 = vrot.lane.b32.xlu1 %v967_v1, %s4420_s16 }
 0x352   : > { %1056 = vrot.lane.b32.xlu1 %v965_v62, %s4420_s16 }
 0x3ac   : > { %v1047_v2 = vpop.permute.xlu1 %1046 }
 0x3ad   : > { %v1061_v3 = vpop.permute.xlu0 %1060 }
 0x3ae   : > { %3568 = vmatpush3.xpose.msk.msra.mxu0 %vm1092_vm1, %v1061_v3 }
 0x3af   : > { %3572 = vmatprep.subr.mxu0 %v4416_v18 }
 0x3b0   : > { %v1049_v4 = vpop.permute.xlu1 %1048 }
 0x3b1   : > { %3570 = vmatmul.mubr.msk.f32.vlgmr.msra.gmra.mrb[8].mxu0 %vm1092_vm1, %v1047_v2  ;;  %v1065_v5 = vpop.permute.xlu0 %1064 }
 0x3b2   : > { %3574 = vmatprep.mubr.msk.f32.mxu0 %vm4417_vm0, %v4416_v18 }
 0x3b4   : > { %v1063_v6 = vpop.permute.xlu1 %1062 }
 0x3b5   : > { %3573 = vmatpush3.xpose.msk.msra.mxu0 %vm1092_vm1, %v1063_v6  ;;  %v1067_v8 = vpop.permute.xlu0 %1066 }
 0x3b6   : > { %3577 = vmatprep.subr.mxu0 %v4416_v18 }
 0x3b8   : > { %v1051_v9 = vpop.permute.xlu1 %1050  ;;  %3575 = vmatmul.mubr.msk.f32.vlgmr.msra.gmra.mrb[10].mxu0 %vm1092_vm1, %v1049_v4 }
 0x3b9   : > { %3578 = vmatpush3.xpose.msk.msra.mxu0 %vm1092_vm1, %v1065_v5  ;;  %v1069_v11 = vpop.permute.xlu0 %1068  ;;  %3579 = vmatprep.mubr.msk.f32.mxu0 %vm4417_vm0, %v4416_v18 }
 0x3ba   : > { %3588 = vmatpush3.xpose.msk.msra.mxu1 %vm1092_vm1, %v1069_v11  ;;  %3582 = vmatprep.subr.mxu0 %v4416_v18 }
 0x3bb   : > { %3597 = vmatprep.subr.mxu1 %v4416_v18 }
 0x3bc   : > { %v1053_v14 = vpop.permute.xlu1 %1052  ;;  %3580 = vmatmul.mubr.msk.f32.vlgmr.msra.gmra.mrb[12].mxu0 %vm1092_vm1, %v1051_v9 }
 0x3bd   : > { %3583 = vmatpush3.xpose.msk.msra.mxu0 %vm1092_vm1, %v1067_v8  ;;  %v1055_v16 = vpop.permute.xlu0 %1054  ;;  %3584 = vmatprep.mubr.msk.f32.mxu0 %vm4417_vm0, %v4416_v18 }
 0x3be   : > { %3590 = vmatmul.mubr.msk.f32.vlgmr.msra.gmra.mrb[2].mxu1 %vm1092_vm1, %v1055_v16  ;;  %3592 = vmatprep.subr.mxu0 %v4416_v18 }
 0x3bf   : > { %3598 = vmatpush3.msra.mxu1 %v5013_v15  ;;  %3599 = vmatprep.mubr.msk.f32.mxu1 %vm4417_vm0, %v4416_v18 }
 0x3c0   : > { %v1071_v17 = vpop.permute.xlu1 %1070  ;;  %3585 = vmatmul.mubr.msk.f32.vlgmr.msra.gmra.mrb[14].mxu0 %vm1092_vm1, %v1053_v14  ;;  %3607 = vmatprep.subr.mxu1 %v4416_v18 }
 0x3c1   : > { %3593 = vmatpush3.xpose.msk.msra.mxu0 %vm1092_vm1, %v1071_v17  ;;  %3594 = vmatprep.mubr.msk.f32.mxu0 %vm4417_vm0, %v4416_v18 }
 0x3c2   : > { %3602 = vmatprep.subr.mxu0 %v4416_v18 }
 0x3c4   : > { %v1057_v20 = vpop.permute.xlu1 %1056 }
 0x3c5   : > { %3595 = vmatmul.mubr.msk.f32.vlgmr.msra.gmra.mrb[16].mxu0 %vm1092_vm1, %v1057_v20 }
 0x3c6   : > { %3603 = vmatpush3.msra.mxu0 %v5030_v19  ;;  %3604 = vmatprep.mubr.msk.f32.mxu0 %vm4417_vm0, %v4416_v18 }
 0x3c7   : > { %3612 = vmatprep.subr.mxu0 %v4416_v18 }
 0x411   : > { %v1163_v22 = vpop.f32.mrb[4].mxu0 }
 0x412   : > { %v1685_v24 = vmul.f32 0.17677669, %v1163_v22  ;;  %v3561_v25 = vpop.f32.mrb[5].mxu0 }
 0x414   : > { %v1700_v26 = vsel %vm5039_vm2, %v1685_v24, -1e+30 }
 0x415   : > { %v1237_v27 = vpop.f32.mrb[6].mxu0  ;;  %v1709_v28 = vsel %vm1708_vm3, %v1700_v26, -inf }
 0x416   : > { %v1686_v29 = vmul.f32 0.17677669, %v1237_v27  ;;  %1710 = vmax.xlane.f32.xlu0 %v1709_v28  ;;  %v3566_v30 = vpop.f32.mrb[7].mxu0 }
 0x418   : > { %v1701_v31 = vsel %vm5039_vm2, %v1686_v29, -1e+30 }
 0x419   : > { %v1712_v32 = vsel %vm1708_vm3, %v1701_v31, -inf }
 0x41a   : > { %1713 = vmax.xlane.f32.xlu1 %v1712_v32 }
 0x484   : > { %v1311_v33 = vpop.f32.mrb[8].mxu0 }
 0x485   : > { %v1687_v34 = vmul.f32 0.17677669, %v1311_v33  ;;  %v3571_v35 = vpop.f32.mrb[9].mxu0 }
 0x487   : > { %v1702_v36 = vsel %vm5039_vm2, %v1687_v34, -1e+30 }
 0x488   : > { %v1715_v37 = vsel %vm1708_vm3, %v1702_v36, -inf }
 0x489   : > { %1716 = vmax.xlane.f32.xlu0 %v1715_v37 }
 0x48b   : > { %v1385_v38 = vpop.f32.mrb[10].mxu0 }
 0x48c   : > { %v1688_v39 = vmul.f32 0.17677669, %v1385_v38  ;;  %v3576_v41 = vpop.f32.mrb[11].mxu0 }
 0x48e   : > { %v1703_v42 = vsel %vm5039_vm2, %v1688_v39, -1e+30 }
 0x48f   : > { %v1459_v43 = vpop.f32.mrb[12].mxu0  ;;  %v1718_v45 = vsel %vm1708_vm3, %v1703_v42, -inf }
 0x490   : > { %v1689_v46 = vmul.f32 0.17677669, %v1459_v43  ;;  %1719 = vmax.xlane.f32.xlu0 %v1718_v45  ;;  %v3581_v47 = vpop.f32.mrb[13].mxu0 }
 0x491   : > { %v1607_v48 = vpop.f32.mrb[2].mxu1 }
 0x492   : > { %v1691_v49 = vmul.f32 0.17677669, %v1607_v48  ;;  %v3591_v50 = vpop.f32.mrb[3].mxu1  ;;  %v1704_v40 = vsel %vm5039_vm2, %v1689_v46, -1e+30 }
 0x493   : > { %v1533_v52 = vpop.f32.mrb[14].mxu0  ;;  %v1721_v54 = vsel %vm1708_vm3, %v1704_v40, -inf }
 0x494   : > { %v1690_v55 = vmul.f32 0.17677669, %v1533_v52  ;;  %1722 = vmax.xlane.f32.xlu0 %v1721_v54  ;;  %v3586_v56 = vpop.f32.mrb[15].mxu0  ;;  %v1706_v57 = vsel %vm5039_vm2, %v1691_v49, -1e+30 }
 0x495   : > { %v1727_v60 = vsel %vm1708_vm3, %v1706_v57, -inf }
 0x496   : > { %v1705_v58 = vsel %vm5039_vm2, %v1690_v55, -1e+30 }
 0x497   : > { %v1724_v59 = vsel %vm1708_vm3, %v1705_v58, -inf }
 0x498   : > { %1725 = vmax.xlane.f32.xlu1 %v1724_v59  ;;  %v1681_v61 = vpop.f32.mrb[16].mxu0  ;;  %1728 = vmax.xlane.f32.xlu0 %v1727_v60 }
 0x499   : > { %v1692_v62 = vmul.f32 0.17677669, %v1681_v61  ;;  %v3596_v63 = vpop.f32.mrb[17].mxu0 }
 0x49b   : > { %v1707_v0 = vsel %vm5039_vm2, %v1692_v62, -1e+30 }
 0x49c   : > { %v1730_v1 = vsel %vm1708_vm3, %v1707_v0, -inf }
 0x49d   : > { %1731 = vmax.xlane.f32.xlu1 %v1730_v1 }
 0x4a3   : > { %v1711_v2 = vpop.xlane.xlu0 %1710 }
 0x4a4   : > { %v1733_v3 = vsub.f32 %v1700_v26, %v1711_v2 }
 0x4a6   : > { %v1741_v4 = vmul.f32 1.442695, %v1733_v3 }
 0x4a7   : > { %v1714_v5 = vpop.xlane.xlu1 %1713 }
 0x4a8   : > { %4024 = vpow2.f32 %v1741_v4  ;;  %v1734_v6 = vsub.f32 %v1701_v31, %v1714_v5 }
 0x4aa   : > { %v1743_v8 = vmul.f32 1.442695, %v1734_v6 }
 0x4ac   : > { %4026 = vpow2.f32 %v1743_v8 }
 0x4ae   : > { %1076 = vrot.lane.b32.xlu1 %v5030_v19, %s4418_s0  ;;  %1074 = vrot.lane.b32.xlu0 %v5013_v15, %s4418_s0 }
 0x4b2   : > { %1080 = vrot.lane.b32.xlu1 %v5013_v15, %s4419_s23  ;;  %v4025_v9 = vpop.eup %4024 }
 0x4b3   : > { %v1757_v10 = vsel %vm1708_vm3, %v4025_v9, 0.0 }
 0x4b6   : > { %1082 = vrot.lane.b32.xlu1 %v5030_v19, %s4419_s23  ;;  %v4027_v11 = vpop.eup %4026 }
 0x4b7   : > { %v1760_v14 = vsel %vm1708_vm3, %v4027_v11, 0.0 }
 0x4cd   : > { %1758 = vadd.xlane.f32.xlu0 %v1757_v10 }
 0x4da   : > { %1761 = vadd.xlane.f32.xlu1 %v1760_v14 }
 0x516   : > { %v1717_v16 = vpop.xlane.xlu0 %1716 }
 0x517   : > { %v1735_v17 = vsub.f32 %v1702_v36, %v1717_v16 }
 0x519   : > { %v1745_v20 = vmul.f32 1.442695, %v1735_v17 }
 0x51b   : > { %4028 = vpow2.f32 %v1745_v20 }
 0x51d   : > { %v1720_v21 = vpop.xlane.xlu0 %1719 }
 0x51e   : > { %v1736_v22 = vsub.f32 %v1703_v42, %v1720_v21  ;;  %v2413_v21 = vld [vmem:[%s4866_s3] sm:$0xff] }
 0x520   : > { %v1747_v23 = vmul.f32 1.442695, %v1736_v22  ;;  %v2414_v22 = vld [vmem:[%s4866_s3 + $0x8] sm:$0xff] }
 0x521   : > { %v1723_v24 = vpop.xlane.xlu0 %1722 }
 0x522   : > { %4030 = vpow2.f32 %v1747_v23  ;;  %v1737_v26 = vsub.f32 %v1704_v40, %v1723_v24  ;;  %v2415_v23 = vld [vmem:[%s4866_s3 + $0x10] sm:$0xff]  ;;  %v3736_v24 = vpack.c.bf16 %v2414_v22, %v2413_v21  ;;  %v3365_v22 = vld [vmem:[%s758_s29] ss:$0 sm:$0xff] }
 0x524   : > { %v1749_v34 = vmul.f32 1.442695, %v1737_v26 }
 0x525   : > { %v4029_v25 = vpop.eup %4028  ;;  %v1726_v27 = vpop.xlane.xlu1 %1725 }
 0x526   : > { %v1729_v28 = vpop.xlane.xlu0 %1728  ;;  %v1738_v29 = vsub.f32 %v1705_v58, %v1726_v27  ;;  %v1763_v31 = vsel %vm1708_vm3, %v4029_v25, 0.0  ;;  %v2417_v27 = vld [vmem:[%s4866_s3 + $0x20] sm:$0xff] }
 0x527   : > { %v1739_v30 = vsub.f32 %v1706_v57, %v1729_v28  ;;  %1764 = vadd.xlane.f32.xlu0 %v1763_v31  ;;  %v2418_v28 = vld [vmem:[%s4866_s3 + $0x28] sm:$0xff] }
 0x528   : > { %v1751_v32 = vmul.f32 1.442695, %v1738_v29  ;;  %v3744_v29 = vpack.c.bf16 %v2418_v28, %v2417_v27 }
 0x529   : > { %v1753_v33 = vmul.f32 1.442695, %v1739_v30 }
 0x52a   : > { %4032 = vpow2.f32 %v1751_v32  ;;  %v1732_v35 = vpop.xlane.xlu1 %1731  ;;  %v1075_v50 = vpop.permute.xlu0 %1074 }
 0x52b   : > { %4034 = vpow2.f32 %v1753_v33  ;;  %v1740_v36 = vsub.f32 %v1707_v0, %v1732_v35  ;;  %v2420_v35 = vld [vmem:[%s4866_s3 + $0x38] sm:$0xff] }
 0x52c   : > { %v4031_v37 = vpop.eup %4030  ;;  %4036 = vpow2.f32 %v1749_v34  ;;  %v2419_v34 = vld [vmem:[%s4866_s3 + $0x30] sm:$0xff] }
 0x52d   : > { %v1755_v38 = vmul.f32 1.442695, %v1740_v36  ;;  %v1766_v39 = vsel %vm1708_vm3, %v4031_v37, 0.0  ;;  %v3748_v36 = vpack.c.bf16 %v2420_v35, %v2419_v34  ;;  %v2553_v34 = vld [vmem:[%s4868_s22] sm:$0xff] }
 0x52e   : > { %1767 = vadd.xlane.f32.xlu1 %v1766_v39  ;;  %v1077_v40 = vpop.permute.xlu1 %1076  ;;  %v2423_v39 = vld [vmem:[%s4866_s3 + $0x50] sm:$0xff]  ;;  %v2557_v35 = vld [vmem:[%s4868_s22 + $0x20] sm:$0xff] }
 0x52f   : > { %4038 = vpow2.f32 %v1755_v38  ;;  %v2422_v38 = vld [vmem:[%s4866_s3 + $0x48] sm:$0xff] }
 0x532   : > { %v1081_v54 = vpop.permute.xlu1 %1080 }
 0x534   : > { %v4033_v41 = vpop.eup %4032 }
 0x535   : > { %v5079_v42 = vpop.eup %4034  ;;  %v1772_v43 = vsel %vm1708_vm3, %v4033_v41, 0.0 }
 0x536   : > { %1773 = vadd.xlane.f32.xlu1 %v1772_v43  ;;  %v1775_v45 = vsel %vm1708_vm3, %v5079_v42, 0.0  ;;  %v4037_v46 = vpop.eup %4036  ;;  %v1083_v55 = vpop.permute.xlu1 %1082  ;;  %v2424_v43 = vld [vmem:[%s4866_s3 + $0x58] sm:$0xff] }
 0x537   : > { %1776 = vadd.xlane.f32.xlu0 %v1775_v45  ;;  %v1769_v48 = vsel %vm1708_vm3, %v4037_v46, 0.0 }
 0x539   : > { %v4039_v47 = vpop.eup %4038 }
 0x53a   : > { %v1778_v49 = vsel %vm1708_vm3, %v4039_v47, 0.0 }
 0x53b   : > { %1770 = vadd.xlane.f32.xlu0 %v1769_v48  ;;  %1779 = vadd.xlane.f32.xlu1 %v1778_v49 }
 0x54c   : > { %1088 = vrot.lane.b32.xlu1 %v5030_v19, %s4420_s16 }
 0x551   : > { %1086 = vrot.lane.b32.xlu0 %v5013_v15, %s4420_s16 }
 0x55a   : > { %v1759_v52 = vpop.xlane.xlu0 %1758 }
 0x55b   : > { %4040 = vrcp.f32 %v1759_v52 }
 0x565   : > { %v4041_v56 = vpop.eup %4040 }
 0x566   : > { %v1789_v57 = vmul.f32 %v4041_v56, %v4025_v9 }
 0x567   : > { %v1762_v58 = vpop.xlane.xlu1 %1761 }
 0x568   : > { %4042 = vrcp.f32 %v1762_v58  ;;  %3600 = vmatmul.mubr.msk.f32.vlgmr.msra.gmra.mrb[4].mxu1 %vm1708_vm3, %v1789_v57 }
 0x569   : > { %3608 = vmatpush3.msra.mxu1 %v1075_v50  ;;  %3609 = vmatprep.mubr.msk.f32.mxu1 %vm4417_vm0, %v4416_v18  ;;  %v2425_v50 = vld [vmem:[%s4866_s3 + $0x60] sm:$0xff] }
 0x56a   : > { %3617 = vmatprep.subr.mxu1 %v4416_v18 }
 0x572   : > { %v4043_v19 = vpop.eup %4042 }
 0x573   : > { %v1790_v15 = vmul.f32 %v4043_v19, %v4027_v11 }
 0x575   : > { %3605 = vmatmul.mubr.msk.f32.vlgmr.msra.gmra.mrb[18].mxu0 %vm1708_vm3, %v1790_v15 }
 0x576   : > { %3613 = vmatpush3.msra.mxu0 %v1077_v40  ;;  %3614 = vmatprep.mubr.msk.f32.mxu0 %vm4417_vm0, %v4416_v18  ;;  %v2426_v40 = vld [vmem:[%s4866_s3 + $0x68] sm:$0xff] }
 0x577   : > { %3622 = vmatprep.subr.mxu0 %v4416_v18  ;;  %v3760_v52 = vpack.c.bf16 %v2426_v40, %v2425_v50  ;;  %v2567_v40 = vld [vmem:[%s4868_s22 + $0x70] sm:$0xff] }
 0x5b4   : > { %v1765_v59 = vpop.xlane.xlu0 %1764 }
 0x5b5   : > { %4044 = vrcp.f32 %v1765_v59 }
 0x5bb   : > { %v1768_v60 = vpop.xlane.xlu1 %1767 }
 0x5bc   : > { %4046 = vrcp.f32 %v1768_v60 }
 0x5bf   : > { %v4045_v61 = vpop.eup %4044 }
 0x5c0   : > { %v1791_v62 = vmul.f32 %v4045_v61, %v4029_v25  ;;  %v2416_v25 = vld [vmem:[%s4866_s3 + $0x18] sm:$0xff] }
 0x5c1   : > { %v3740_v26 = vpack.c.bf16 %v2416_v25, %v2415_v23 }
 0x5c2   : > { %3610 = vmatmul.mubr.msk.f32.vlgmr.msra.gmra.mrb[6].mxu1 %vm1708_vm3, %v1791_v62 }
 0x5c3   : > { %3618 = vmatpush3.msra.mxu1 %v1081_v54  ;;  %v1774_v63 = vpop.xlane.xlu1 %1773  ;;  %3619 = vmatprep.mubr.msk.f32.mxu1 %vm4417_vm0, %v4416_v18  ;;  %v2427_v54 = vld [vmem:[%s4866_s3 + $0x70] sm:$0xff] }
 0x5c4   : > { %4048 = vrcp.f32 %v1774_v63  ;;  %v1777_v0 = vpop.xlane.xlu0 %1776  ;;  %3627 = vmatprep.subr.mxu1 %v4416_v18 }
 0x5c6   : > { %v4047_v1 = vpop.eup %4046 }
 0x5c7   : > { %v1792_v2 = vmul.f32 %v4047_v1, %v4031_v37  ;;  %v2421_v37 = vld [vmem:[%s4866_s3 + $0x40] sm:$0xff] }
 0x5c8   : > { %v1771_v3 = vpop.xlane.xlu0 %1770  ;;  %v1780_v4 = vpop.xlane.xlu1 %1779 }
 0x5c9   : > { %4050 = vrcp.f32 %v1771_v3  ;;  %3615 = vmatmul.mubr.msk.f32.vlgmr.msra.gmra.mrb[20].mxu0 %vm1708_vm3, %v1792_v2 }
 0x5ca   : > { %4052 = vrcp.f32 %v1780_v4  ;;  %3623 = vmatpush3.msra.mxu0 %v1083_v55  ;;  %3624 = vmatprep.mubr.msk.f32.mxu0 %vm4417_vm0, %v4416_v18  ;;  %v2428_v55 = vld [vmem:[%s4866_s3 + $0x78] sm:$0xff] }
 0x5cb   : > { %4054 = vrcp.f32 %v1777_v0  ;;  %3632 = vmatprep.subr.mxu0 %v4416_v18  ;;  %v3764_v56 = vpack.c.bf16 %v2428_v55, %v2427_v54  ;;  %v2574_v54 = vld [vmem:[%s4868_s22 + $0xa8] sm:$0xff] }
 0x5cc   : > { %v1089_v8 = vpop.permute.xlu1 %1088  ;;  %v1087_v17 = vpop.permute.xlu0 %1086 }
 0x5ce   : > { %v4049_v5 = vpop.eup %4048 }
 0x5cf   : > { %v1794_v6 = vmul.f32 %v4049_v5, %v4033_v41 }
 0x5d1   : > { %3625 = vmatmul.mubr.msk.f32.vlgmr.msra.gmra.mrb[22].mxu0 %vm1708_vm3, %v1794_v6 }
 0x5d2   : > { %3633 = vmatpush3.msra.mxu0 %v1089_v8  ;;  %3634 = vmatprep.mubr.msk.f32.mxu0 %vm4417_vm0, %v4416_v18 }
 0x5d3   : > { %v4051_v9 = vpop.eup %4050 }
 0x5d4   : > { %v4053_v10 = vpop.eup %4052  ;;  %v1793_v11 = vmul.f32 %v4051_v9, %v4037_v46  ;;  %v3756_v46 = vpack.c.bf16 %v2424_v43, %v2423_v39  ;;  %v2568_v43 = vld [vmem:[%s4868_s22 + $0x78] sm:$0xff] }
 0x5d5   : > { %v4055_v14 = vpop.eup %4054  ;;  %v1796_v16 = vmul.f32 %v4053_v10, %v4039_v47 }
 0x5d6   : > { %3620 = vmatmul.mubr.msk.f32.vlgmr.msra.gmra.mrb[8].mxu1 %vm1708_vm3, %v1793_v11  ;;  %v1795_v20 = vmul.f32 %v4055_v14, %v5079_v42  ;;  %v3752_v42 = vpack.c.bf16 %v2422_v38, %v2421_v37  ;;  %v2559_v37 = vld [vmem:[%s4868_s22 + $0x30] sm:$0xff]  ;;  %v2562_v38 = vld [vmem:[%s4868_s22 + $0x48] sm:$0xff] }
 0x5d7   : > { %3628 = vmatpush3.msra.mxu1 %v1087_v17  ;;  %3635 = vmatmul.mubr.msk.f32.vlgmr.msra.gmra.mrb[24].mxu0 %vm1708_vm3, %v1796_v16 }
 0x5d8   : > { %3629 = vmatprep.mubr.msk.f32.mxu1 %vm4417_vm0, %v4416_v18  ;;  %2703 = vmatprep.mubr.f32.mxu0 %v4416_v18 }
 0x5d9   : > { %3737 = vmatprep.subr.bf16.mxu1 %v3736_v24 }
 0x5da   : > { %3630 = vmatmul.mubr.msk.f32.vlgmr.msra.gmra.mrb[10].mxu1 %vm1708_vm3, %v1795_v20 }
 0x5db   : > { %3739 = vmatpush3.bf16.msra.mxu1 %v3736_v24 }
 0x5dc   : > { %3741 = vmatprep.subr.bf16.mxu1 %v3740_v26 }
 0x5df   : > { %3743 = vmatpush3.bf16.msra.mxu1 %v3740_v26 }
 0x5e0   : > { %3745 = vmatprep.subr.bf16.mxu1 %v3744_v29 }
 0x5e3   : > { %3747 = vmatpush3.bf16.msra.mxu1 %v3744_v29  ;;  %v2554_v29 = vld [vmem:[%s4868_s22 + $0x8] sm:$0xff] }
 0x5e4   : > { %3749 = vmatprep.subr.bf16.mxu1 %v3748_v36 }
 0x5e7   : > { %3751 = vmatpush3.bf16.msra.mxu1 %v3748_v36  ;;  %v2555_v36 = vld [vmem:[%s4868_s22 + $0x10] sm:$0xff] }
 0x5e8   : > { %3753 = vmatprep.subr.bf16.mxu1 %v3752_v42  ;;  %v3802_v39 = vpack.c.bf16 %v2559_v37, %v2555_v36  ;;  %v2591_v36 = vld [vmem:[%s4868_s22 + $0x130] sm:$0xff] }
 0x5eb   : > { %3755 = vmatpush3.bf16.msra.mxu1 %v3752_v42  ;;  %v2564_v42 = vld [vmem:[%s4868_s22 + $0x58] sm:$0xff] }
 0x5ec   : > { %3757 = vmatprep.subr.bf16.mxu1 %v3756_v46 }
 0x5ef   : > { %3759 = vmatpush3.bf16.msra.mxu1 %v3756_v46  ;;  %v3804_v46 = vpack.c.bf16 %v2568_v43, %v2564_v42  ;;  %v2600_v43 = vld [vmem:[%s4868_s22 + $0x178] sm:$0xff] }
 0x5f0   : > { %3761 = vmatprep.subr.bf16.mxu1 %v3760_v52 }
 0x5f3   : > { %3763 = vmatpush3.bf16.msra.mxu1 %v3760_v52  ;;  %v2570_v52 = vld [vmem:[%s4868_s22 + $0x88] sm:$0xff] }
 0x5f4   : > { %3765 = vmatprep.subr.bf16.mxu1 %v3764_v56 }
 0x5f7   : > { %3767 = vmatpush3.bf16.msra.mxu1 %v3764_v56  ;;  %v3776_v56 = vpack.c.bf16 %v2574_v54, %v2570_v52  ;;  %v2606_v54 = vld [vmem:[%s4868_s22 + $0x1a8] sm:$0xff] }
 0x63b   : > { %v1866_v30 = vpop.f32.mrb[4].mxu1 }
 0x63c   : > { %v3601_v31 = vpop.f32.mrb[5].mxu1 }
 0x63d   : > { %v2556_v31 = vld [vmem:[%s4868_s22 + $0x18] sm:$0xff] }
 0x648   : > { %v1939_v32 = vpop.f32.mrb[18].mxu0 }
 0x649   : > { %v3606_v33 = vpop.f32.mrb[19].mxu0 }
 0x64a   : > { %v2560_v33 = vld [vmem:[%s4868_s22 + $0x38] sm:$0xff] }
 0x695   : > { %v2012_v41 = vpop.f32.mrb[6].mxu1 }
 0x696   : > { %v3611_v45 = vpop.f32.mrb[7].mxu1 }
 0x69c   : > { %v2085_v47 = vpop.f32.mrb[20].mxu0 }
 0x69d   : > { %v4005_v48 = vpack.i.bf16 %v2085_v47, %v2012_v41  ;;  %v3616_v49 = vpop.f32.mrb[21].mxu0  ;;  %v2566_v41 = vld [vmem:[%s4868_s22 + $0x68] sm:$0xff]  ;;  %v2561_v47 = vld [vmem:[%s4868_s22 + $0x40] sm:$0xff] }
 0x69e   : > { %v3772_v45 = vpack.c.bf16 %v2566_v41, %v2562_v38  ;;  %v2563_v49 = vld [vmem:[%s4868_s22 + $0x50] sm:$0xff]  ;;  %v2594_v38 = vld [vmem:[%s4868_s22 + $0x148] sm:$0xff]  ;;  %v2596_v41 = vld [vmem:[%s4868_s22 + $0x158] sm:$0xff] }
 0x69f   : > { %4006 = vrot.lane.b32.xlu0 %v4005_v48, %s4420_s16  ;;  %v2565_v48 = vld [vmem:[%s4868_s22 + $0x60] sm:$0xff]  ;;  %v3806_v55 = vpack.c.bf16 %v2567_v40, %v2563_v49  ;;  %v2595_v49 = vld [vmem:[%s4868_s22 + $0x150] sm:$0xff]  ;;  %v2602_v40 = vld [vmem:[%s4868_s22 + $0x188] sm:$0xff] }
 0x6a0   : > { %v3774_v50 = vpack.c.bf16 %v2565_v48, %v2561_v47  ;;  %v3820_v47 = vpack.c.bf16 %v2600_v43, %v2596_v41  ;;  %v2881_v43 = vld [vmem:[%s4872_s9 + $0x100] sm:$0xff] }
 0x6a4   : > { %v2231_v57 = vpop.f32.mrb[22].mxu0 }
 0x6a5   : > { %v3626_v58 = vpop.f32.mrb[23].mxu0 }
 0x6a6   : > { %v2576_v58 = vld [vmem:[%s4868_s22 + $0xb8] sm:$0xff] }
 0x6a9   : > { %v2158_v19 = vpop.f32.mrb[8].mxu1 }
 0x6aa   : > { %v4010_v15 = vpack.i.bf16 %v2231_v57, %v2158_v19  ;;  %v3621_v59 = vpop.f32.mrb[9].mxu1  ;;  %v2377_v60 = vpop.f32.mrb[24].mxu0  ;;  %v2572_v57 = vld [vmem:[%s4868_s22 + $0x98] sm:$0xff]  ;;  %v2569_v19 = vld [vmem:[%s4868_s22 + $0x80] sm:$0xff] }
 0x6ab   : > { %v3636_v61 = vpop.f32.mrb[25].mxu0  ;;  %v2573_v59 = vld [vmem:[%s4868_s22 + $0xa0] sm:$0xff] }
 0x6ac   : > { %4011 = vrot.lane.b32.xlu1 %v4010_v15, %s4419_s23  ;;  %v3808_v15 = vpack.c.bf16 %v2576_v58, %v2572_v57  ;;  %v2575_v61 = vld [vmem:[%s4868_s22 + $0xb0] sm:$0xff]  ;;  %v3792_v57 = vpack.c.bf16 %v2606_v54, %v2602_v40  ;;  %v2851_v40 = vld [vmem:[%s4872_s9 + $0x10] sm:$0xff] }
 0x6ad   : > { %v2304_v62 = vpop.f32.mrb[10].mxu1 }
 0x6ae   : > { %v4015_v63 = vpack.i.bf16 %v2377_v60, %v2304_v62  ;;  %v3631_v0 = vpop.f32.mrb[11].mxu1  ;;  %v2571_v60 = vld [vmem:[%s4868_s22 + $0x90] sm:$0xff]  ;;  %v3778_v62 = vpack.c.bf16 %v2573_v59, %v2569_v19  ;;  %v2601_v19 = vld [vmem:[%s4868_s22 + $0x180] sm:$0xff] }
 0x6af   : > { %v2603_v59 = vld [vmem:[%s4868_s22 + $0x190] sm:$0xff] }
 0x6b0   : > { %4016 = vrot.lane.b32.xlu0 %v4015_v63, %s4418_s0  ;;  %v3810_v63 = vpack.c.bf16 %v2575_v61, %v2571_v60  ;;  %v2607_v61 = vld [vmem:[%s4868_s22 + $0x1b0] sm:$0xff] }
 0x711   : > { %v4007_v1 = vpop.permute.xlu0 %4006 }
 0x712   : > { %v4009_v3 = vunpack.i.h.bf16 %v4007_v1  ;;  %v4008_v4 = vunpack.i.l.bf16 %v4007_v1 }
 0x714   : > { %v2406_v9 = vsel %vm1092_vm1, %v1939_v32, %v4009_v3  ;;  %v2405_v14 = vsel %vm1092_vm1, %v1866_v30, %v4008_v4  ;;  %v2558_v30 = vld [vmem:[%s4868_s22 + $0x28] sm:$0xff] }
 0x715   : > { %v3768_v32 = vpack.c.bf16 %v2558_v30, %v2554_v29  ;;  %v2590_v29 = vld [vmem:[%s4868_s22 + $0x128] sm:$0xff]  ;;  %v2588_v30 = vld [vmem:[%s4868_s22 + $0x118] sm:$0xff] }
 0x717   : > { %3769 = vmatprep.subr.bf16.mxu0 %v3768_v32  ;;  %v2592_v32 = vld [vmem:[%s4868_s22 + $0x138] sm:$0xff] }
 0x71e   : > { %v4012_v2 = vpop.permute.xlu1 %4011 }
 0x71f   : > { %v4014_v5 = vunpack.i.h.bf16 %v4012_v2  ;;  %v4013_v6 = vunpack.i.l.bf16 %v4012_v2 }
 0x721   : > { %v2408_v16 = vsel %vm2407_vm4, %v2405_v14, %v4013_v6  ;;  %v2409_v17 = vsel %vm2407_vm4, %v2406_v9, %v4014_v5  ;;  %v2578_v9 = vld [vmem:[%s4868_s22 + $0xc8] sm:$0xff] }
 0x722   : > { %v4017_v8 = vpop.permute.xlu0 %4016 }
 0x723   : > { %v4019_v10 = vunpack.i.h.bf16 %v4017_v8  ;;  %v4018_v11 = vunpack.i.l.bf16 %v4017_v8 }
 0x725   : > { %v2411_v20 = vsel %vm2410_vm5, %v2408_v16, %v4018_v11  ;;  %v2412_v21 = vsel %vm2410_vm5, %v2409_v17, %v4019_v10  ;;  %v2582_v10 = vld [vmem:[%s4868_s22 + $0xe8] sm:$0xff]  ;;  %v2580_v11 = vld [vmem:[%s4868_s22 + $0xd8] sm:$0xff]  ;;  %v2577_v17 = vld [vmem:[%s4868_s22 + $0xc0] sm:$0xff] }
 0x726   : > { %3669 = vmatprep.mubr.f32.mxu1 %v2411_v20  ;;  %v3780_v14 = vpack.c.bf16 %v2582_v10, %v2578_v9  ;;  %v2584_v16 = vld [vmem:[%s4868_s22 + $0xf8] sm:$0xff]  ;;  %v2581_v20 = vld [vmem:[%s4868_s22 + $0xe0] sm:$0xff]  ;;  %v2611_v10 = vld [vmem:[%s4868_s22 + $0x1d0] sm:$0xff] }
 0x727   : > { %3670 = vmatmul.mubr.f32.vlgmr.msra.gmra.mrb[12].mxu1 %v2412_v21  ;;  %v3812_v21 = vpack.c.bf16 %v2584_v16, %v2580_v11  ;;  %v2613_v9 = vld [vmem:[%s4868_s22 + $0x1e0] sm:$0xff]  ;;  %v2615_v11 = vld [vmem:[%s4868_s22 + $0x1f0] sm:$0xff] }
 0x728   : > { %2780 = vmatprep.mubr.f32.mxu1 %v4416_v18  ;;  %v3830_v16 = vpack.c.bf16 %v2615_v11, %v2611_v10  ;;  %v2903_v10 = vld [vmem:[%s4872_s9 + $0x1b0] sm:$0xff] }
 0x7fa   : > { %v3671_v23 = vpop.f32.mrb[12].mxu1 }
 0x7fb   : > { %v2508_v24 = vadd.f32 %v3671_v23, %v3365_v22  ;;  %v2502_v25 = vpop.f32.mrb[13].mxu1  ;;  %v2579_v23 = vld [vmem:[%s4868_s22 + $0xd0] sm:$0xff] }
 0x7fc   : > { %v2503_v26 = vadd.f32 %v3365_v22, %v2502_v25  ;;  %v3782_v22 = vpack.c.bf16 %v2581_v20, %v2577_v17 }
 0x7fd   : > { %v5144_v27 = vadd.f32 %v2508_v24, %v4880_v13  ;;  %v3800_v13 = vpack.c.bf16 %v2560_v33, %v2556_v31  ;;  %v2583_v24 = vld [vmem:[%s4868_s22 + $0xf0] sm:$0xff]  ;;  %v2585_v33 = vld [vmem:[%s4868_s22 + $0x100] sm:$0xff] }
 0x7fe   : > { %v5147_v28 = vadd.f32 %v2503_v26, %v4877_v12  ;;  %v3770_v12 = vpack.c.bf16 %v2557_v35, %v2553_v34  ;;  %v3814_v25 = vpack.c.bf16 %v2583_v24, %v2579_v23  ;;  %v2586_v26 = vld [vmem:[%s4868_s22 + $0x108] sm:$0xff]  ;;  %v2589_v34 = vld [vmem:[%s4868_s22 + $0x120] sm:$0xff]  ;;  %v3816_v35 = vpack.c.bf16 %v2592_v32, %v2588_v30 }
 0x7ff   : > { %2517 = vadd.xlane.f32.xlu0 %v5144_v27  ;;  %3801 = vmatprep.subr.bf16.mxu1 %v3800_v13  ;;  %v3784_v31 = vpack.c.bf16 %v2590_v29, %v2586_v26  ;;  %v3786_v13 = vpack.c.bf16 %v2589_v34, %v2585_v33  ;;  %v3366_v26 = vld [vmem:[%s761_s24] ss:$0 sm:$0xff] }
 0x800   : > { %2515 = vadd.xlane.f32.xlu1 %v5147_v28  ;;  %3771 = vmatpush1.bf16.msra.mxu0 %v3770_v12  ;;  %v2587_v12 = vld [vmem:[%s4868_s22 + $0x110] sm:$0xff]  ;;  %v3367_v30 = vld [vmem:[%s764_s1] ss:$0 sm:$0xff] }
 0x801   : > { %3803 = vmatpush1.bf16.msra.mxu1 %v3802_v39  ;;  %3773 = vmatprep.subr.bf16.mxu0 %v3772_v45  ;;  %v3818_v37 = vpack.c.bf16 %v2591_v36, %v2587_v12  ;;  %v2598_v39 = vld [vmem:[%s4868_s22 + $0x168] sm:$0xff]  ;;  %v2593_v45 = vld [vmem:[%s4868_s22 + $0x140] sm:$0xff]  ;;  %v2866_v12 = vld [vmem:[%s4872_s9 + $0x88] sm:$0xff] }
 0x802   : > { %3805 = vmatprep.subr.bf16.mxu1 %v3804_v46  ;;  %v3788_v42 = vpack.c.bf16 %v2598_v39, %v2594_v38  ;;  %v2597_v46 = vld [vmem:[%s4868_s22 + $0x160] sm:$0xff]  ;;  %v2897_v36 = vld [vmem:[%s4872_s9 + $0x180] sm:$0xff]  ;;  %v2850_v39 = vld [vmem:[%s4872_s9 + $0x8] sm:$0xff] }
 0x803   : > { %v3790_v48 = vpack.c.bf16 %v2597_v46, %v2593_v45  ;;  %v2849_v38 = vld [vmem:[%s4872_s9] sm:$0xff]  ;;  %v2867_v46 = vld [vmem:[%s4872_s9 + $0x90] sm:$0xff] }
 0x804   : > { %3775 = vmatpush1.bf16.msra.mxu0 %v3774_v50  ;;  %v2599_v50 = vld [vmem:[%s4868_s22 + $0x170] sm:$0xff] }
 0x805   : > { %3807 = vmatpush1.bf16.msra.mxu1 %v3806_v55  ;;  %3777 = vmatprep.subr.bf16.mxu0 %v3776_v56  ;;  %v3822_v52 = vpack.c.bf16 %v2599_v50, %v2595_v49  ;;  %v2604_v55 = vld [vmem:[%s4868_s22 + $0x198] sm:$0xff]  ;;  %v2900_v50 = vld [vmem:[%s4872_s9 + $0x198] sm:$0xff] }
 0x806   : > { %3809 = vmatprep.subr.bf16.mxu1 %v3808_v15  ;;  %v2608_v56 = vld [vmem:[%s4868_s22 + $0x1b8] sm:$0xff]  ;;  %v2605_v15 = vld [vmem:[%s4868_s22 + $0x1a0] sm:$0xff] }
 0x807   : > { %v3824_v58 = vpack.c.bf16 %v2608_v56, %v2604_v55  ;;  %v3794_v60 = vpack.c.bf16 %v2605_v15, %v2601_v19  ;;  %v2883_v56 = vld [vmem:[%s4872_s9 + $0x110] sm:$0xff]  ;;  %v2869_v19 = vld [vmem:[%s4872_s9 + $0xa0] sm:$0xff]  ;;  %v2870_v15 = vld [vmem:[%s4872_s9 + $0xa8] sm:$0xff] }
 0x808   : > { %3779 = vmatpush1.bf16.msra.mxu0 %v3778_v62  ;;  %v2610_v62 = vld [vmem:[%s4868_s22 + $0x1c8] sm:$0xff] }
 0x809   : > { %3811 = vmatpush1.bf16.msra.mxu1 %v3810_v63  ;;  %3781 = vmatprep.subr.bf16.mxu0 %v3780_v14  ;;  %v2614_v63 = vld [vmem:[%s4868_s22 + $0x1e8] sm:$0xff] }
 0x80a   : > { %3813 = vmatprep.subr.bf16.mxu1 %v3812_v21 }
 0x80c   : > { %3783 = vmatpush1.bf16.msra.mxu0 %v3782_v22 }
 0x80d   : > { %3815 = vmatpush1.bf16.msra.mxu1 %v3814_v25  ;;  %3785 = vmatprep.subr.bf16.mxu0 %v3784_v31 }
 0x80e   : > { %3817 = vmatprep.subr.bf16.mxu1 %v3816_v35 }
 0x810   : > { %3787 = vmatpush1.bf16.msra.mxu0 %v3786_v13  ;;  %v2865_v13 = vld [vmem:[%s4872_s9 + $0x80] sm:$0xff] }
 0x811   : > { %3819 = vmatpush1.bf16.msra.mxu1 %v3818_v37  ;;  %3789 = vmatprep.subr.bf16.mxu0 %v3788_v42  ;;  %v3832_v37 = vpack.c.bf16 %v2866_v12, %v2865_v13  ;;  %v3834_v42 = vpack.c.bf16 %v2850_v39, %v2849_v38  ;;  %v2890_v13 = vld [vmem:[%s4872_s9 + $0x148] sm:$0xff]  ;;  %v2908_v39 = vld [vmem:[%s4872_s9 + $0x1d8] sm:$0xff] }
 0x812   : > { %3821 = vmatprep.subr.bf16.mxu1 %v3820_v47  ;;  %v2868_v47 = vld [vmem:[%s4872_s9 + $0x98] sm:$0xff] }
 0x813   : > { %v3836_v49 = vpack.c.bf16 %v2868_v47, %v2867_v46  ;;  %v2892_v46 = vld [vmem:[%s4872_s9 + $0x158] sm:$0xff] }
 0x814   : > { %3791 = vmatpush1.bf16.msra.mxu0 %v3790_v48  ;;  %v2899_v48 = vld [vmem:[%s4872_s9 + $0x190] sm:$0xff] }
 0x815   : > { %3823 = vmatpush1.bf16.msra.mxu1 %v3822_v52  ;;  %3793 = vmatprep.subr.bf16.mxu0 %v3792_v57  ;;  %v2852_v52 = vld [vmem:[%s4872_s9 + $0x18] sm:$0xff]  ;;  %v3868_v54 = vpack.c.bf16 %v2900_v50, %v2899_v48  ;;  %v2877_v48 = vld [vmem:[%s4872_s9 + $0xe0] sm:$0xff] }
 0x816   : > { %3825 = vmatprep.subr.bf16.mxu1 %v3824_v58  ;;  %v3838_v55 = vpack.c.bf16 %v2852_v52, %v2851_v40  ;;  %v2884_v57 = vld [vmem:[%s4872_s9 + $0x118] sm:$0xff]  ;;  %v2909_v50 = vld [vmem:[%s4872_s9 + $0x1e0] sm:$0xff]  ;;  %v2910_v52 = vld [vmem:[%s4872_s9 + $0x1e8] sm:$0xff] }
 0x817   : > { %v3870_v58 = vpack.c.bf16 %v2884_v57, %v2883_v56  ;;  %v3888_v56 = vpack.c.bf16 %v2910_v52, %v2909_v50 }
 0x818   : > { %3795 = vmatpush1.bf16.msra.mxu0 %v3794_v60  ;;  %v3840_v60 = vpack.c.bf16 %v2870_v15, %v2869_v19  ;;  %v2894_v19 = vld [vmem:[%s4872_s9 + $0x168] sm:$0xff] }
 0x88c   : > { %v2518_v0 = vpop.xlane.xlu0 %2517 }
 0x88d   : > { %v2516_v1 = vpop.xlane.xlu1 %2515  ;;  %v2520_v2 = vmul.f32 0.0078125, %v2518_v0  ;;  %v3826_v0 = vpack.c.bf16 %v2607_v61, %v2603_v59  ;;  %v2901_v59 = vld [vmem:[%s4872_s9 + $0x1a0] sm:$0xff]  ;;  %v2902_v61 = vld [vmem:[%s4872_s9 + $0x1a8] sm:$0xff] }
 0x88e   : > { %v2519_v3 = vmul.f32 0.0078125, %v2516_v1  ;;  %v3796_v1 = vpack.c.bf16 %v2614_v63, %v2610_v62  ;;  %v2853_v62 = vld [vmem:[%s4872_s9 + $0x20] sm:$0xff]  ;;  %v2854_v63 = vld [vmem:[%s4872_s9 + $0x28] sm:$0xff] }
 0x88f   : > { %v5179_v5 = vsub.f32 %v5144_v27, %v2520_v2  ;;  %v2612_v2 = vld [vmem:[%s4868_s22 + $0x1d8] sm:$0xff]  ;;  %3827 = vmatpush1.bf16.msra.mxu1 %v3826_v0  ;;  %v3872_v0 = vpack.c.bf16 %v2902_v61, %v2901_v59 }
 0x890   : > { %v5176_v4 = vsub.f32 %v5147_v28, %v2519_v3  ;;  %v2616_v3 = vld [vmem:[%s4868_s22 + $0x1f8] sm:$0xff]  ;;  %3797 = vmatprep.subr.bf16.mxu0 %v3796_v1  ;;  %v3842_v1 = vpack.c.bf16 %v2854_v63, %v2853_v62  ;;  %v2912_v63 = vld [vmem:[%s4872_s9 + $0x1f8] sm:$0xff] }
 0x891   : > { %v2524_v8 = vmul.f32 %v5179_v5, %v5179_v5  ;;  %v2879_v59 = vld [vmem:[%s4872_s9 + $0xf0] sm:$0xff] }
 0x892   : > { %v2523_v6 = vmul.f32 %v5176_v4, %v5176_v4  ;;  %v2911_v61 = vld [vmem:[%s4872_s9 + $0x1f0] sm:$0xff] }
 0x894   : > { %2525 = vadd.xlane.f32.xlu0 %v2523_v6  ;;  %v2609_v6 = vld [vmem:[%s4868_s22 + $0x1c0] sm:$0xff] }
 0x895   : > { %v3798_v14 = vpack.c.bf16 %v2613_v9, %v2609_v6  ;;  %v2872_v9 = vld [vmem:[%s4872_s9 + $0xb8] sm:$0xff] }
 0x897   : > { %3799 = vmatpush1.bf16.msra.mxu0 %v3798_v14  ;;  %v2904_v14 = vld [vmem:[%s4872_s9 + $0x1b8] sm:$0xff] }
 0x898   : > { %2527 = vadd.xlane.f32.xlu0 %v2524_v8  ;;  %v3828_v8 = vpack.c.bf16 %v2616_v3, %v2612_v2  ;;  %3833 = vmatprep.subr.bf16.mxu0 %v3832_v37  ;;  %v2885_v2 = vld [vmem:[%s4872_s9 + $0x120] sm:$0xff]  ;;  %v2886_v3 = vld [vmem:[%s4872_s9 + $0x128] sm:$0xff]  ;;  %v2876_v37 = vld [vmem:[%s4872_s9 + $0xd8] sm:$0xff] }
 0x899   : > { %v3874_v6 = vpack.c.bf16 %v2886_v3, %v2885_v2  ;;  %v3892_v2 = vpack.c.bf16 %v2912_v63, %v2911_v61 }
 0x89a   : > { %3829 = vmatprep.subr.bf16.mxu1 %v3828_v8  ;;  %v2871_v8 = vld [vmem:[%s4872_s9 + $0xb0] sm:$0xff] }
 0x89b   : > { %3831 = vmatpush1.bf16.msra.mxu1 %v3830_v16  ;;  %v3844_v11 = vpack.c.bf16 %v2872_v9, %v2871_v8  ;;  %v2855_v16 = vld [vmem:[%s4872_s9 + $0x30] sm:$0xff]  ;;  %v2896_v8 = vld [vmem:[%s4872_s9 + $0x178] sm:$0xff] }
 0x921   : > { %v2526_v17 = vpop.xlane.xlu0 %2525 }
 0x922   : > { %v2529_v20 = vmul.f32 0.0078125, %v2526_v17  ;;  %v2856_v17 = vld [vmem:[%s4872_s9 + $0x38] sm:$0xff] }
 0x924   : > { %v2531_v21 = vadd.f32 1e-05, %v2529_v20  ;;  %v3876_v20 = vpack.c.bf16 %v2904_v14, %v2903_v10  ;;  %v2617_v10 = vld [vmem:[%s4870_s27] sm:$0xf] }
 0x925   : > { %v2528_v22 = vpop.xlane.xlu0 %2527  ;;  %v2622_v14 = vrot.slane %v2617_v10, %v879_v44 }
 0x926   : > { %4056 = vrsqrt.f32 %v2531_v21  ;;  %v2530_v23 = vmul.f32 0.0078125, %v2528_v22  ;;  %v3846_v21 = vpack.c.bf16 %v2856_v17, %v2855_v16  ;;  %v2887_v22 = vld [vmem:[%s4872_s9 + $0x130] sm:$0xff]  ;;  %v2630_v16 = vrot.slane %v2617_v10, %v887_v7 }
 0x927   : > { %v2626_v17 = vrot.slane %v2617_v10, %v883_v53 }
 0x928   : > { %v2532_v24 = vadd.f32 1e-05, %v2530_v23  ;;  %v2888_v23 = vld [vmem:[%s4872_s9 + $0x138] sm:$0xff] }
 0x92a   : > { %4058 = vrsqrt.f32 %v2532_v24  ;;  %v3878_v24 = vpack.c.bf16 %v2888_v23, %v2887_v22 }
 0x930   : > { %v4057_v25 = vpop.eup %4056 }
 0x931   : > { %v2535_v29 = vmul.f32 %v4057_v25, %v5176_v4  ;;  %v2873_v25 = vld [vmem:[%s4872_s9 + $0xc0] sm:$0xff] }
 0x933   : > { %v2543_v31 = vmul.f32 %v3366_v26, %v2535_v29  ;;  %v2905_v29 = vld [vmem:[%s4872_s9 + $0x1c0] sm:$0xff] }
 0x934   : > { %v4059_v32 = vpop.eup %4058 }
 0x935   : > { %v2551_v33 = vadd.f32 %v3367_v30, %v2543_v31  ;;  %v2536_v34 = vmul.f32 %v4059_v32, %v5179_v5  ;;  %v2898_v5 = vld [vmem:[%s4872_s9 + $0x188] sm:$0xff]  ;;  %v2857_v32 = vld [vmem:[%s4872_s9 + $0x40] sm:$0xff] }
 0x936   : > { %v3864_v41 = vpack.c.bf16 %v2898_v5, %v2897_v36  ;;  %v2906_v31 = vld [vmem:[%s4872_s9 + $0x1c8] sm:$0xff]  ;;  %v2875_v36 = vld [vmem:[%s4872_s9 + $0xd0] sm:$0xff] }
 0x937   : > { %2704 = vmatmul.mubr.f32.vlgmr.msra.gmra.mrb[26].mxu0 %v2551_v33  ;;  %2781 = vmatmul.mubr.f32.vlgmr.msra.gmra.mrb[14].mxu1 %v2551_v33  ;;  %v2544_v35 = vmul.f32 %v3366_v26, %v2536_v34  ;;  %v2874_v26 = vld [vmem:[%s4872_s9 + $0xc8] sm:$0xff]  ;;  %v3880_v34 = vpack.c.bf16 %v2906_v31, %v2905_v29  ;;  %v2907_v5 = vld [vmem:[%s4872_s9 + $0x1d0] sm:$0xff]  ;;  %v3852_v38 = vpack.c.bf16 %v2876_v37, %v2875_v36 }
 0x938   : > { %2709 = vmatprep.mubr.f32.mxu0 %v4416_v18  ;;  %2786 = vmatprep.mubr.f32.mxu1 %v4416_v18  ;;  %v2882_v18 = vld [vmem:[%s4872_s9 + $0x108] sm:$0xff] }
 0x939   : > { %v2552_v4 = vadd.f32 %v3367_v30, %v2544_v35  ;;  %v3866_v45 = vpack.c.bf16 %v2882_v18, %v2881_v43  ;;  %3865 = vmatprep.subr.bf16.mxu1 %v3864_v41  ;;  %3835 = vmatpush3.bf16.msra.mxu0 %v3834_v42  ;;  %v3848_v30 = vpack.c.bf16 %v2874_v26, %v2873_v25  ;;  %v2858_v33 = vld [vmem:[%s4872_s9 + $0x48] sm:$0xff]  ;;  %v2859_v41 = vld [vmem:[%s4872_s9 + $0x50] sm:$0xff]  ;;  %v2860_v42 = vld [vmem:[%s4872_s9 + $0x58] sm:$0xff] }
 0x93a   : > { %3837 = vmatprep.subr.bf16.mxu0 %v3836_v49  ;;  %v3850_v35 = vpack.c.bf16 %v2858_v33, %v2857_v32  ;;  %v3884_v43 = vpack.c.bf16 %v2908_v39, %v2907_v5  ;;  %v3854_v18 = vpack.c.bf16 %v2860_v42, %v2859_v41  ;;  %v2878_v49 = vld [vmem:[%s4872_s9 + $0xe8] sm:$0xff] }
 0x93b   : > { %2710 = vmatmul.mubr.f32.gmra.mrb[28].mxu0 %v2552_v4  ;;  %2787 = vmatmul.mubr.f32.gmra.mrb[16].mxu1 %v2552_v4  ;;  %v2889_v4 = vld [vmem:[%s4872_s9 + $0x140] sm:$0xff]  ;;  %v3856_v40 = vpack.c.bf16 %v2878_v49, %v2877_v48 }
 0x93c   : > { %3867 = vmatpush3.bf16.msra.mxu1 %v3866_v45  ;;  %v3882_v12 = vpack.c.bf16 %v2890_v13, %v2889_v4  ;;  %v2891_v45 = vld [vmem:[%s4872_s9 + $0x150] sm:$0xff] }
 0x93d   : > { %3869 = vmatprep.subr.bf16.mxu1 %v3868_v54  ;;  %3839 = vmatpush3.bf16.msra.mxu0 %v3838_v55  ;;  %v3886_v47 = vpack.c.bf16 %v2892_v46, %v2891_v45  ;;  %v2861_v54 = vld [vmem:[%s4872_s9 + $0x60] sm:$0xff]  ;;  %v2862_v55 = vld [vmem:[%s4872_s9 + $0x68] sm:$0xff] }
 0x93e   : > { %3841 = vmatprep.subr.bf16.mxu0 %v3840_v60  ;;  %v3858_v57 = vpack.c.bf16 %v2862_v55, %v2861_v54  ;;  %v2880_v60 = vld [vmem:[%s4872_s9 + $0xf8] sm:$0xff] }
 0x93f   : > { %v3860_v62 = vpack.c.bf16 %v2880_v60, %v2879_v59 }
 0x940   : > { %3871 = vmatpush3.bf16.msra.mxu1 %v3870_v58  ;;  %v2893_v58 = vld [vmem:[%s4872_s9 + $0x160] sm:$0xff] }
 0x941   : > { %3873 = vmatprep.subr.bf16.mxu1 %v3872_v0  ;;  %3843 = vmatpush3.bf16.msra.mxu0 %v3842_v1  ;;  %v3890_v15 = vpack.c.bf16 %v2894_v19, %v2893_v58  ;;  %v2863_v0 = vld [vmem:[%s4872_s9 + $0x70] sm:$0xff]  ;;  %v2864_v1 = vld [vmem:[%s4872_s9 + $0x78] sm:$0xff] }
 0x942   : > { %3845 = vmatprep.subr.bf16.mxu0 %v3844_v11  ;;  %v3862_v3 = vpack.c.bf16 %v2864_v1, %v2863_v0  ;;  %v2633_v11 = vsub.s32 3, %v4962_v51 }
 0x944   : > { %3875 = vmatpush3.bf16.msra.mxu1 %v3874_v6  ;;  %v2895_v6 = vld [vmem:[%s4872_s9 + $0x170] sm:$0xff] }
 0x945   : > { %3877 = vmatprep.subr.bf16.mxu1 %v3876_v20  ;;  %3847 = vmatpush3.bf16.msra.mxu0 %v3846_v21  ;;  %v3894_v9 = vpack.c.bf16 %v2896_v8, %v2895_v6  ;;  %v2634_v20 = vrot.slane %v2617_v10, %v2633_v11 }
 0x946   : > { %3849 = vmatprep.subr.bf16.mxu0 %v3848_v30 }
 0x948   : > { %3879 = vmatpush3.bf16.msra.mxu1 %v3878_v24 }
 0x949   : > { %3881 = vmatprep.subr.bf16.mxu1 %v3880_v34  ;;  %3851 = vmatpush3.bf16.msra.mxu0 %v3850_v35 }
 0x94a   : > { %3853 = vmatprep.subr.bf16.mxu0 %v3852_v38 }
 0x94c   : > { %3883 = vmatpush3.bf16.msra.mxu1 %v3882_v12 }
 0x94d   : > { %3885 = vmatprep.subr.bf16.mxu1 %v3884_v43  ;;  %3855 = vmatpush3.bf16.msra.mxu0 %v3854_v18 }
 0x94e   : > { %3857 = vmatprep.subr.bf16.mxu0 %v3856_v40 }
 0x950   : > { %3887 = vmatpush3.bf16.msra.mxu1 %v3886_v47 }
 0x951   : > { %3889 = vmatprep.subr.bf16.mxu1 %v3888_v56  ;;  %3859 = vmatpush3.bf16.msra.mxu0 %v3858_v57 }
 0x952   : > { %3861 = vmatprep.subr.bf16.mxu0 %v3860_v62 }
 0x954   : > { %3891 = vmatpush3.bf16.msra.mxu1 %v3890_v15 }
 0x955   : > { %3893 = vmatprep.subr.bf16.mxu1 %v3892_v2  ;;  %3863 = vmatpush3.bf16.msra.mxu0 %v3862_v3 }
 0x958   : > { %3895 = vmatpush3.bf16.msra.mxu1 %v3894_v9 }
 0xa0a   : > { %v2705_v21 = vpop.f32.mrb[26].mxu0  ;;  %v2782_v22 = vpop.f32.mrb[14].mxu1 }
 0xa0b   : > { %v5311_v23 = vadd.f32 %v2705_v21, %v2622_v14  ;;  %v5313_v24 = vadd.f32 %v2782_v22, %v2630_v16  ;;  %v2707_v25 = vpop.f32.mrb[27].mxu0  ;;  %v2784_v26 = vpop.f32.mrb[15].mxu1 }
 0xa0c   : > { %v2708_v29 = vadd.f32 %v2707_v25, %v2626_v17  ;;  %v5315_v30 = vadd.f32 %v2784_v26, %v2634_v20 }
 0xa0d   : > { %v2793_v44 = vmul.f32 -1.702, %v5311_v23  ;;  %v2795_v31 = vmul.f32 -1.702, %v5313_v24 }
 0xa0e   : > { %v2794_v7 = vmul.f32 -1.702, %v2708_v29  ;;  %v2796_v51 = vmul.f32 -1.702, %v5315_v30  ;;  %v2711_v53 = vpop.f32.mrb[28].mxu0  ;;  %v2788_v32 = vpop.f32.mrb[16].mxu1 }
 0xa0f   : > { %v2801_v33 = vmul.f32 1.442695, %v2793_v44  ;;  %v2805_v34 = vmul.f32 1.442695, %v2795_v31  ;;  %v5320_v35 = vadd.f32 %v2711_v53, %v2622_v14  ;;  %v5322_v4 = vadd.f32 %v2788_v32, %v2630_v16  ;;  %v2713_v13 = vpop.f32.mrb[29].mxu0  ;;  %v2790_v12 = vpop.f32.mrb[17].mxu1 }
 0xa10   : > { %v2803_v36 = vmul.f32 1.442695, %v2794_v7  ;;  %v2807_v37 = vmul.f32 1.442695, %v2796_v51  ;;  %v2714_v5 = vadd.f32 %v2713_v13, %v2626_v17  ;;  %v2791_v38 = vadd.f32 %v2790_v12, %v2634_v20 }
 0xa11   : > { %4060 = vpow2.f32 %v2801_v33  ;;  %v2797_v39 = vmul.f32 -1.702, %v5320_v35  ;;  %v2799_v41 = vmul.f32 -1.702, %v5322_v4 }
 0xa12   : > { %4062 = vpow2.f32 %v2805_v34  ;;  %v2798_v42 = vmul.f32 -1.702, %v2714_v5  ;;  %v2800_v43 = vmul.f32 -1.702, %v2791_v38 }
 0xa13   : > { %4064 = vpow2.f32 %v2803_v36  ;;  %v2809_v18 = vmul.f32 1.442695, %v2797_v39  ;;  %v2813_v45 = vmul.f32 1.442695, %v2799_v41 }
 0xa14   : > { %4066 = vpow2.f32 %v2807_v37  ;;  %v2811_v46 = vmul.f32 1.442695, %v2798_v42  ;;  %v2815_v47 = vmul.f32 1.442695, %v2800_v43 }
 0xa15   : > { %4068 = vpow2.f32 %v2809_v18 }
 0xa16   : > { %4070 = vpow2.f32 %v2813_v45 }
 0xa17   : > { %4072 = vpow2.f32 %v2811_v46 }
 0xa18   : > { %4074 = vpow2.f32 %v2815_v47 }
 0xa1b   : > { %v4061_v48 = vpop.eup %4060 }
 0xa1c   : > { %v4063_v49 = vpop.eup %4062  ;;  %v2817_v50 = vadd.f32 1.0, %v4061_v48 }
 0xa1d   : > { %v4065_v40 = vpop.eup %4064  ;;  %v2819_v52 = vadd.f32 1.0, %v4063_v49 }
 0xa1e   : > { %v4067_v54 = vpop.eup %4066  ;;  %4076 = vrcp.f32 %v2817_v50  ;;  %v2818_v55 = vadd.f32 1.0, %v4065_v40 }
 0xa1f   : > { %v4069_v56 = vpop.eup %4068  ;;  %4078 = vrcp.f32 %v2819_v52  ;;  %v2820_v57 = vadd.f32 1.0, %v4067_v54 }
 0xa20   : > { %v4071_v58 = vpop.eup %4070  ;;  %4080 = vrcp.f32 %v2818_v55  ;;  %v2821_v19 = vadd.f32 1.0, %v4069_v56 }
 0xa21   : > { %v4073_v15 = vpop.eup %4072  ;;  %4082 = vrcp.f32 %v2820_v57  ;;  %v2823_v59 = vadd.f32 1.0, %v4071_v58 }
 0xa22   : > { %v4075_v60 = vpop.eup %4074  ;;  %4084 = vrcp.f32 %v2821_v19  ;;  %v2822_v61 = vadd.f32 1.0, %v4073_v15 }
 0xa23   : > { %4086 = vrcp.f32 %v2823_v59  ;;  %v2824_v62 = vadd.f32 1.0, %v4075_v60 }
 0xa24   : > { %4088 = vrcp.f32 %v2822_v61 }
 0xa25   : > { %4090 = vrcp.f32 %v2824_v62 }
 0xa28   : > { %v4077_v63 = vpop.eup %4076 }
 0xa29   : > { %v4079_v0 = vpop.eup %4078  ;;  %v2841_v8 = vmul.f32 %v4077_v63, %v5311_v23 }
 0xa2a   : > { %v4081_v1 = vpop.eup %4080  ;;  %v2843_v11 = vmul.f32 %v4079_v0, %v5313_v24  ;;  %v3368_v24 = vld [vmem:[%s663_s6] ss:$0 sm:$0xff] }
 0xa2b   : > { %v4083_v2 = vpop.eup %4082  ;;  %v2842_v3 = vmul.f32 %v4081_v1, %v2708_v29 }
 0xa2c   : > { %v4085_v6 = vpop.eup %4084  ;;  %v2844_v9 = vmul.f32 %v4083_v2, %v5315_v30 }
 0xa2d   : > { %v4087_v10 = vpop.eup %4086  ;;  %2984 = vmatprep.mubr.f32.mxu0 %v2842_v3  ;;  %v2845_v20 = vmul.f32 %v4085_v6, %v5320_v35 }
 0xa2e   : > { %v4089_v14 = vpop.eup %4088  ;;  %3059 = vmatprep.mubr.f32.mxu1 %v2844_v9  ;;  %2985 = vmatmul.mubr.f32.vlgmr.msra.gmra.mrb[30].mxu0 %v2841_v8  ;;  %v2847_v22 = vmul.f32 %v4087_v10, %v5322_v4 }
 0xa2f   : > { %v4091_v16 = vpop.eup %4090  ;;  %v2846_v17 = vmul.f32 %v4089_v14, %v2714_v5  ;;  %3060 = vmatmul.mubr.f32.vlgmr.msra.gmra.mrb[18].mxu1 %v2843_v11 }
 0xa30   : > { %v2848_v21 = vmul.f32 %v4091_v16, %v2791_v38 }
 0xa31   : > { %2989 = vmatprep.mubr.f32.mxu0 %v2846_v17 }
 0xa32   : > { %3064 = vmatprep.mubr.f32.mxu1 %v2848_v21  ;;  %2990 = vmatmul.mubr.f32.gmra.mrb[32].mxu0 %v2845_v20 }
 0xa33   : > { %3065 = vmatmul.mubr.f32.gmra.mrb[20].mxu1 %v2847_v22 }
 0xb01   : > { %v3478_v23 = vpop.f32.mrb[30].mxu0 }
 0xb02   : > { %v3516_v25 = vpop.f32.mrb[18].mxu1  ;;  %v3479_v26 = vpop.f32.mrb[31].mxu0 }
 0xb03   : > { %v3480_v29 = vadd.f32 %v3479_v26, %v3478_v23  ;;  %v3517_v30 = vpop.f32.mrb[19].mxu1 }
 0xb04   : > { %v3518_v44 = vadd.f32 %v3517_v30, %v3516_v25 }
 0xb05   : > { %v2987_v31 = vadd.f32 %v3480_v29, %v3368_v24  ;;  %v3481_v7 = vpop.f32.mrb[32].mxu0 }
 0xb06   : > { %v3519_v51 = vpop.f32.mrb[20].mxu1  ;;  %v3482_v53 = vpop.f32.mrb[33].mxu0 }
 0xb07   : > { %v3062_v32 = vadd.f32 %v3518_v44, %v2987_v31  ;;  %v3483_v33 = vadd.f32 %v3482_v53, %v3481_v7  ;;  %v3520_v34 = vpop.f32.mrb[21].mxu1 }
 0xb08   : > { %v3521_v35 = vadd.f32 %v3520_v34, %v3519_v51 }
 0xb09   : > { %v3070_v4 = vadd.f32 %v3062_v32, %v5147_v28  ;;  %v2992_v13 = vadd.f32 %v3483_v33, %v3368_v24  ;;  %3077 = sbr.rel (%p3369_p4) target bundleno = 2832 (0xb10), region = 116 }
 0xb0b   : > { %3072 = vst [vmem:[#allocation2] sm:$0xff] %v3070_v4  ;;  %v3067_v12 = vadd.f32 %v3521_v35, %v2992_v13  ;;  %3078 = vst [vmem:[#allocation14] sm:$0xff] (!%p3369_p4), %v3070_v4 }
 0xb0d   : > { %v3071_v36 = vadd.f32 %v3067_v12, %v5144_v27 }
 0xb0f   : > { %3073 = vst [vmem:[#allocation2 + $0x8] sm:$0xff] %v3071_v36  ;;  %3079 = vst [vmem:[#allocation14 + $0x8] sm:$0xff] (!%p3369_p4), %v3071_v36 }
 0xb10 PF: > { %p3955_p2 = scmp.eq.s32.totalorder %s4518_s17, 1  ;;  %s4421_s1 = smov [#allocation14]  }
 0xb11   : > { %s3086_s2 = sshll.u32 %s4421_s1, 4  ;;  %s3087_s2 = int_to_ptr.vmem [resolvable:$true] %s3086_s2 }
 0xb12   : > { %s4328_s26 = scalar_lea.vmem %s3087_s2, 256  ;;  %p4335_p5 = scmp.lt.s32.totalorder %s3087_s2, %s3087_s2 }
 0xb13   : > { %p4329_p9 = scmp.ne.s32.totalorder %s3087_s2, %s4328_s26  ;;  %p4336_p13 = scmp.lt.s32.totalorder %s4328_s26, %s4328_s26 }
 0xb15   : > { %p4330_p7 = pnand %p4329_p9, %p3955_p2  ;;  %p4337_p11 = por %p4336_p13, %p4335_p5 }
 0xb17   : > { %p4331_p0 = pneg %p4330_p7 }
 0xb19   : > { %p4338_p12 = pnand %p4337_p11, %p4331_p0 }
 0xb1b   : > { %4341 = shalt.err (!%p4338_p12)
}
 0xb1c   : > { %s5467_s27 = sld [smem:[#allocation34_spill]] }
 0xb22   : > { %s4342_s9 = scalar_lea.hbm %s5467_s27, 256 }
 0xb23   : > { %p4343_p10 = scmp.ne.s32.totalorder %s5467_s27, %s4342_s9  ;;  %p4348_p1 = scmp.lt.u32.totalorder %s4342_s9, %s5467_s27 }
 0xb25   : > { %p4344_p3 = pnand %p4343_p10, %p3955_p2 }
 0xb27   : > { %p4345_p8 = pneg %p4344_p3 }
 0xb29   : > { %p4350_p6 = pnand %p4348_p1, %p4345_p8 }
 0xb2b   : > { %4353 = shalt.err (!%p4350_p6)
}
 0xb2c   : > { %s4422_s8 = smov 128   ;;  %s4423_s7 = smov 8  }
 0xb2d   : > { %3921 = dma.vmem_to_hbm [thread:$0]  (%p3955_p2), %s3087_s2, 256, %s5467_s27, [#allocation5], %s4422_s8, %s4422_s8, %s4423_s7  }
 0xb2e   : > { %4383 = dma.done.wait (%p3955_p2), [#allocation5], 256  }
 0xb2f   : > { %4385 = vsyncadd (%p3955_p2), [#allocation5], 4294967040 }
 0xb30 PF: > { %s5468_s16 = sld [smem:[#allocation20_spill]]  ;;  %s5469_s0 = sld [smem:[#allocation19_spill]] }
 0xb31   : > { %s5470_s15 = sld [smem:[#allocation21_spill]]  ;;  %s5471_s29 = smov %s4392_s30 }
 0xb36   : > { %p24_p4 = scmp.ge.s32.totalorder %s5468_s16, 4   ;;  %s5472_s30 = smov %s5469_s0 }
 0xb38   :  { %26 = sbr.rel (!%p24_p4) target bundleno = 18 (0x12), region = 201 }
 0xb3f   :  { %3102 = vsyncpa [#allocation4], 1 }
 0xb40   :  { %3104 = vsyncpa [#allocation4 + $0x1], 1 }
 0xb41   :  { %3105 = vsyncpa [#allocation7], 1 }
 0xb42   :  { %3106 = vsyncpa [#allocation5], 1 }
 0xb43   :  { %3108 = vsyncpa [#allocation5 + $0x1], 1 }

</bundles_post_ra>
